<compile_context>
chip_gen: v7x
topology: tpu7x:2x2x1
jax: 0.10.0
libtpu: 0.0.40
codegen_flags: <defaults>
</compile_context>

<pallas_src>
import functools

import jax
import jax.numpy as jnp
from jax.experimental import pallas as pl
from jax.experimental.pallas import tpu as pltpu


def _clam_sb_kernel(h_ref, w1_ref, b1_ref, wab_ref, bab_ref, wc_ref, bc_ref,
                    araw_ref, m_out_ref, l_out_ref, acc_out_ref,
                    m_sc, l_sc, acc_sc,
                    *, n_total, tile_n, d_attn, tiles_per_core, needs_mask):
    c = pl.program_id(0)                       # core index (parallel)
    j = pl.program_id(1)                       # tile index within this core (reduction)
    tile_idx = c * tiles_per_core + j
    start = tile_idx * tile_n

    @pl.when(j == 0)
    def _init():
        m_sc[...] = jnp.full((1, 1), -1e30, jnp.float32)
        l_sc[...] = jnp.zeros_like(l_sc)
        acc_sc[...] = jnp.zeros_like(acc_sc)

    # --- fc: Linear(L0 -> L1) + ReLU (bf16 MXU, f32 accumulate) ---
    h1 = jnp.dot(h_ref[...], w1_ref[...], preferred_element_type=jnp.float32)
    h1 = jnp.maximum(h1 + b1_ref[...], 0.0)                      # (TN, L1) f32

    if needs_mask:
        # sanitize rows beyond the end of the bag (padding may be garbage/NaN)
        row_ids = jax.lax.broadcasted_iota(jnp.int32, (tile_n, 1), 0) + start
        h1 = jnp.where(row_ids < n_total, h1, 0.0)

    # single bf16 copy reused by both MXU consumers
    h1_bf = h1.astype(jnp.bfloat16)

    # --- gated attention net: fused Wa|(0.5*Wb) matmul, one bf16 tanh pass ---
    gates = jnp.dot(h1_bf, wab_ref[...],
                    preferred_element_type=jnp.float32) + bab_ref[...]   # (TN, 2D) f32
    t = jnp.tanh(gates.astype(jnp.bfloat16))                     # one EUP pass (bf16)
    a = t[:, :d_attn]                                            # tanh(x_a)
    b = t[:, d_attn:] * 0.5 + 0.5                                # sigmoid(x_b) = 0.5*tanh(x_b/2)+0.5
    gated = a * b                                                # (TN, D) bf16

    # --- attention logits: per-row dot with Wc row, small relayout to (1, TN) ---
    scores_col = jnp.sum(gated * wc_ref[...], axis=-1, keepdims=True) + bc_ref[...]  # (TN,1) f32
    scores = jnp.transpose(scores_col)                           # (1, TN) lane-dense
    araw_ref[...] = scores                                       # unmasked A_raw tile

    if needs_mask:
        lane_ids = jax.lax.broadcasted_iota(jnp.int32, (1, tile_n), 1) + start
        scores = jnp.where(lane_ids < n_total, scores, -1e30)

    # --- online softmax + weighted-sum accumulation over this core's tiles ---
    m_old = m_sc[...]
    m_new = jnp.maximum(m_old, jnp.max(scores, axis=1, keepdims=True))
    alpha = jnp.exp(m_old - m_new)
    w = jnp.exp(scores - m_new)                                  # (1, TN) f32
    l_sc[...] = alpha * l_sc[...] + jnp.sum(w, axis=1, keepdims=True)
    acc_sc[...] = alpha * acc_sc[...] + jnp.dot(
        w.astype(jnp.bfloat16), h1_bf, preferred_element_type=jnp.float32)
    m_sc[...] = m_new

    # --- per-core partial stats written on the core's last tile ---
    @pl.when(j == tiles_per_core - 1)
    def _writeout():
        m_out_ref[0] = m_sc[...]
        l_out_ref[0] = l_sc[...]
        acc_out_ref[0] = acc_sc[...]


def clam_sb_forward(h, params, *, tile_n=1024, num_cores=2,
                    vmem_limit_bytes=48 * 1024 * 1024):
    N, L0 = h.shape
    L1 = params["W1"].shape[1]
    D = params["Wa"].shape[1]
    C = params["Wclf"].shape[1]

    # Fuse the gate projections; fold the sigmoid's 0.5 argument scale into Wb/bb
    # so one tanh covers both nonlinearities in the kernel.
    wab = jnp.concatenate([params["Wa"], 0.5 * params["Wb"]], axis=1)   # (L1, 2D)
    bab = jnp.concatenate([params["ba"], 0.5 * params["bb"]], axis=1)   # (1, 2D)
    wc_row = params["Wc"].reshape(1, D)                                 # (1, D) row layout

    # bf16 for the large streamed / MXU operands; everything else stays f32.
    # TODO(synk): pass h already in bf16 to avoid this extra HBM convert pass.
    h_bf = h if h.dtype == jnp.bfloat16 else h.astype(jnp.bfloat16)
    w1_bf = params["W1"].astype(jnp.bfloat16)
    wab_bf = wab.astype(jnp.bfloat16)

    assert tile_n % 128 == 0, "tile_n must be a multiple of 128"
    tn = tile_n if N > tile_n else N            # small bags: one full-extent block
    n_tiles = pl.cdiv(N, tn)                    # tiles that actually contain data
    nc = max(1, min(num_cores, n_tiles))        # v7x: shard the bag over TensorCores
    tpc = pl.cdiv(n_tiles, nc)                  # tiles per core
    total_tiles = nc * tpc
    n_padded = total_tiles * tn
    needs_mask = (n_padded != N)                # trace-time: skip masks for clean bags

    kernel = functools.partial(_clam_sb_kernel, n_total=N, tile_n=tn, d_attn=D,
                               tiles_per_core=tpc, needs_mask=needs_mask)

    const = lambda c, j: (0, 0)
    # clamp the h block index so fully-padded trailing tiles re-read a valid block
    h_map = lambda c, j: (jnp.minimum(c * tpc + j, n_tiles - 1), 0)
    araw_map = lambda c, j: (0, c * tpc + j)
    part_map = lambda c, j: (c, 0, 0)

    araw_pad, m_part, l_part, acc_part = pl.pallas_call(
        kernel,
        out_shape=(
            jax.ShapeDtypeStruct((1, n_padded), jnp.float32),   # A_raw (lane-dense, padded)
            jax.ShapeDtypeStruct((nc, 1, 1), jnp.float32),      # per-core running max
            jax.ShapeDtypeStruct((nc, 1, 1), jnp.float32),      # per-core softmax denom
            jax.ShapeDtypeStruct((nc, 1, L1), jnp.float32),     # per-core weighted sum
        ),
        grid_spec=pltpu.PrefetchScalarGridSpec(
            num_scalar_prefetch=0,
            grid=(nc, tpc),
            in_specs=[
                pl.BlockSpec((tn, L0), h_map),       # h tile (streamed)
                pl.BlockSpec((L0, L1), const),       # W1 (VMEM-resident)
                pl.BlockSpec((1, L1), const),        # b1
                pl.BlockSpec((L1, 2 * D), const),    # Wa | 0.5*Wb fused
                pl.BlockSpec((1, 2 * D), const),     # ba | 0.5*bb fused
                pl.BlockSpec((1, D), const),         # Wc (row layout)
                pl.BlockSpec((1, 1), const),         # bc
            ],
            out_specs=(
                pl.BlockSpec((1, tn), araw_map),
                pl.BlockSpec((1, 1, 1), part_map),
                pl.BlockSpec((1, 1, 1), part_map),
                pl.BlockSpec((1, 1, L1), part_map),
            ),
            scratch_shapes=[
                pltpu.VMEM((1, 1), jnp.float32),     # running max
                pltpu.VMEM((1, 1), jnp.float32),     # running softmax denom
                pltpu.VMEM((1, L1), jnp.float32),    # running weighted sum
            ],
        ),
        compiler_params=pltpu.CompilerParams(
            # bag split is parallel (sharded across TCs on v7x); tiles-per-core is
            # the softmax reduction axis.
            dimension_semantics=("parallel", "arbitrary"),
            vmem_limit_bytes=vmem_limit_bytes,       # keep <= ~48-56 MiB for v7x (64 MiB VMEM)
        ),
    )(h_bf, w1_bf, params["b1"], wab_bf, bab, wc_row, params["bc"])

    # --- tiny cross-core combine + classifier head (a few KB of work; wrapper glue) ---
    m_p = m_part[:, 0, 0]                            # (nc,)
    l_p = l_part[:, 0, 0]                            # (nc,)
    acc_p = acc_part[:, 0, :]                        # (nc, L1)
    m_glob = jnp.max(m_p)
    scale = jnp.exp(m_p - m_glob)                    # (nc,)
    l_tot = jnp.sum(l_p * scale)
    M = (jnp.sum(acc_p * scale[:, None], axis=0) / l_tot)[None, :]   # (1, L1) exact division
    logits = M @ params["Wclf"] + params["bclf"]
    Y_prob = jax.nn.softmax(logits, axis=1)
    Y_hat = jnp.argmax(logits, axis=1).reshape(1, 1)  # matches torch.topk(..., 1)[1]
    A_raw = araw_pad[:, :N]
    results_dict = {}
    return logits, Y_prob, Y_hat, A_raw, results_dict, M


def init_params(key, L0, L1, D, C):
    ks = jax.random.split(key, 10)
    s = 0.05
    return {
        "W1":   s * jax.random.normal(ks[0], (L0, L1), jnp.float32),
        "b1":   s * jax.random.normal(ks[1], (1, L1), jnp.float32),
        "Wa":   s * jax.random.normal(ks[2], (L1, D), jnp.float32),
        "ba":   s * jax.random.normal(ks[3], (1, D), jnp.float32),
        "Wb":   s * jax.random.normal(ks[4], (L1, D), jnp.float32),
        "bb":   s * jax.random.normal(ks[5], (1, D), jnp.float32),
        "Wc":   s * jax.random.normal(ks[6], (D, 1), jnp.float32),
        "bc":   s * jax.random.normal(ks[7], (1, 1), jnp.float32),
        "Wclf": s * jax.random.normal(ks[8], (L1, C), jnp.float32),
        "bclf": s * jax.random.normal(ks[9], (1, C), jnp.float32),
    }


def reference_forward(h, p):
    h1 = jnp.maximum(h @ p["W1"] + p["b1"], 0.0)
    a = jnp.tanh(h1 @ p["Wa"] + p["ba"])
    b = jax.nn.sigmoid(h1 @ p["Wb"] + p["bb"])
    A = (a * b) @ p["Wc"] + p["bc"]              # (N, 1)
    A_raw = A.T                                  # (1, N)
    A_sm = jax.nn.softmax(A_raw, axis=1)
    M = A_sm @ h1
    logits = M @ p["Wclf"] + p["bclf"]
    y_prob = jax.nn.softmax(logits, axis=1)
    return logits, y_prob, A_raw, M


if __name__ == "__main__":
    # Small, shape-consistent scaling of [1024, 512, 256].  Three configs exercise:
    #   (1) 2-way core split + ragged last tile + one fully-padded tile,
    #   (2) single-core path + ragged last tile,
    #   (3) clean multiple (mask-free trace path) with the core split.
    N, L0, L1, D, C = 300, 256, 128, 128, 2
    key = jax.random.PRNGKey(0)
    k_h, k_p = jax.random.split(key)
    h = jax.random.normal(k_h, (N, L0), jnp.float32)
    params = init_params(k_p, L0, L1, D, C)

    ref_full = reference_forward(h, params)
    h_even = h[:256]
    ref_even = reference_forward(h_even, params)

    cases = [
        (clam_sb_forward(h, params, tile_n=128, num_cores=2), ref_full, N),
        (clam_sb_forward(h, params, tile_n=128, num_cores=1), ref_full, N),
        (clam_sb_forward(h_even, params, tile_n=128, num_cores=2), ref_even, 256),
    ]

    for (logits, y_prob, y_hat, a_raw, _, M), (rl, rp, ra, rM), n in cases:
        jax.block_until_ready((logits, y_prob, y_hat, a_raw, M))
        assert logits.shape == (1, C) and y_prob.shape == (1, C)
        assert y_hat.shape == (1, 1) and a_raw.shape == (1, n)
        # bf16 matmuls / bf16 tanh -> relaxed tolerance vs f32 reference
        assert jnp.allclose(a_raw, ra, atol=2e-2, rtol=2e-2), "A_raw mismatch"
        assert jnp.allclose(M, rM, atol=2e-2, rtol=2e-2), "M mismatch"
        assert jnp.allclose(logits, rl, atol=2e-2, rtol=2e-2), "logits mismatch"
        assert jnp.allclose(y_prob, rp, atol=2e-2, rtol=2e-2), "Y_prob mismatch"

    print("KERNEL_OK")
</pallas_src>

<mosaic_0001>
module attributes {stable_mosaic.version = 11 : i64} {
  func.func @_clam_sb_kernel(%arg0: i32, %arg1: i32, %arg2: memref<128x256xbf16, #tpu.memory_space<vmem>>, %arg3: memref<256x128xbf16, #tpu.memory_space<vmem>>, %arg4: memref<1x128xf32, #tpu.memory_space<vmem>>, %arg5: memref<128x256xbf16, #tpu.memory_space<vmem>>, %arg6: memref<1x256xf32, #tpu.memory_space<vmem>>, %arg7: memref<1x128xf32, #tpu.memory_space<vmem>>, %arg8: memref<1x1xf32, #tpu.memory_space<vmem>>, %arg9: memref<1x128xf32, #tpu.memory_space<vmem>>, %arg10: memref<1x1x1xf32, #tpu.memory_space<vmem>>, %arg11: memref<1x1x1xf32, #tpu.memory_space<vmem>>, %arg12: memref<1x1x128xf32, #tpu.memory_space<vmem>>, %arg13: memref<1x1xf32, #tpu.memory_space<vmem>>, %arg14: memref<1x1xf32, #tpu.memory_space<vmem>>, %arg15: memref<1x128xf32, #tpu.memory_space<vmem>>) attributes {dimension_semantics = [#tpu.dimension_semantics<parallel>, #tpu.dimension_semantics<arbitrary>], iteration_bounds = array<i64: 2, 2>, scalar_prefetch = 0 : i64, scratch_operands = 3 : i64, tpu.core_type = #tpu.core_type<tc>, window_params = [{transform_indices = @transform_0, window_bounds = array<i64: 128, 256>}, {pipeline_mode = #tpu.pipeline_mode<synchronous>, transform_indices = @transform_1, window_bounds = array<i64: 256, 128>}, {pipeline_mode = #tpu.pipeline_mode<synchronous>, transform_indices = @transform_2, window_bounds = array<i64: 1, 128>}, {pipeline_mode = #tpu.pipeline_mode<synchronous>, transform_indices = @transform_3, window_bounds = array<i64: 128, 256>}, {pipeline_mode = #tpu.pipeline_mode<synchronous>, transform_indices = @transform_4, window_bounds = array<i64: 1, 256>}, {pipeline_mode = #tpu.pipeline_mode<synchronous>, transform_indices = @transform_5, window_bounds = array<i64: 1, 128>}, {pipeline_mode = #tpu.pipeline_mode<synchronous>, transform_indices = @transform_6, window_bounds = array<i64: 1, 1>}, {transform_indices = @transform_7, window_bounds = array<i64: 1, 128>}, {transform_indices = @transform_8, window_bounds = array<i64: 1, 1, 1>}, {transform_indices = @transform_9, window_bounds = array<i64: 1, 1, 1>}, {transform_indices = @transform_10, window_bounds = array<i64: 1, 1, 128>}]} {
    %c2_i32 = arith.constant 2 : i32
    %0 = arith.muli %arg0, %c2_i32 : i32
    %1 = arith.addi %0, %arg1 : i32
    %c128_i32 = arith.constant 128 : i32
    %2 = arith.muli %1, %c128_i32 : i32
    %c0_i32 = arith.constant 0 : i32
    %3 = arith.cmpi eq, %arg1, %c0_i32 : i32
    %4 = arith.extui %3 : i1 to i32
    %c0_i32_0 = arith.constant 0 : i32
    %5 = arith.cmpi ne, %4, %c0_i32_0 : i32
    scf.if %5 {
      %cst_40 = arith.constant -1.000000e+30 : f32
      %82 = vector.broadcast %cst_40 : f32 to vector<1x1xf32>
      %c0_41 = arith.constant 0 : index
      %c0_42 = arith.constant 0 : index
      %83 = vector.load %arg13[%c0_41, %c0_42] : memref<1x1xf32, #tpu.memory_space<vmem>>, vector<1x1xf32>
      tpu.vector_store %arg13[%c0_41, %c0_42], %82 {strides = array<i32>} : memref<1x1xf32, #tpu.memory_space<vmem>>, vector<1x1xf32>,
      %cst_43 = arith.constant 0.000000e+00 : f32
      %84 = vector.broadcast %cst_43 : f32 to vector<1x1xf32>
      %c0_44 = arith.constant 0 : index
      %c0_45 = arith.constant 0 : index
      %85 = vector.load %arg14[%c0_44, %c0_45] : memref<1x1xf32, #tpu.memory_space<vmem>>, vector<1x1xf32>
      tpu.vector_store %arg14[%c0_44, %c0_45], %84 {strides = array<i32>} : memref<1x1xf32, #tpu.memory_space<vmem>>, vector<1x1xf32>,
      %cst_46 = arith.constant 0.000000e+00 : f32
      %86 = vector.broadcast %cst_46 : f32 to vector<1x128xf32>
      %c0_47 = arith.constant 0 : index
      %c0_48 = arith.constant 0 : index
      %87 = vector.load %arg15[%c0_47, %c0_48] : memref<1x128xf32, #tpu.memory_space<vmem>>, vector<1x128xf32>
      tpu.vector_store %arg15[%c0_47, %c0_48], %86 {strides = array<i32>} : memref<1x128xf32, #tpu.memory_space<vmem>>, vector<1x128xf32>,
    } else {
    }
    %c0 = arith.constant 0 : index
    %c0_1 = arith.constant 0 : index
    %6 = vector.load %arg2[%c0, %c0_1] : memref<128x256xbf16, #tpu.memory_space<vmem>>, vector<128x256xbf16>
    %c0_2 = arith.constant 0 : index
    %c0_3 = arith.constant 0 : index
    %7 = vector.load %arg3[%c0_2, %c0_3] : memref<256x128xbf16, #tpu.memory_space<vmem>>, vector<256x128xbf16>
    %cst = arith.constant dense<0.000000e+00> : vector<128x128xf32>
    %8 = tpu.matmul %6, %7, %cst {dimension_numbers = #tpu.dot_dimension_numbers<[1], [0], [0], [1], [0, 0, 1, 1], [], []>} : vector<128x256xbf16>, vector<256x128xbf16>, vector<128x128xf32> -> vector<128x128xf32>
    %c0_4 = arith.constant 0 : index
    %c0_5 = arith.constant 0 : index
    %9 = vector.load %arg4[%c0_4, %c0_5] : memref<1x128xf32, #tpu.memory_space<vmem>>, vector<1x128xf32>
    %10 = vector.broadcast %9 : vector<1x128xf32> to vector<128x128xf32>
    %11 = arith.addf %8, %10 : vector<128x128xf32>
    %cst_6 = arith.constant 0.000000e+00 : f32
    %12 = vector.broadcast %cst_6 : f32 to vector<128x128xf32>
    %13 = arith.maximumf %11, %12 : vector<128x128xf32>
    %14 = tpu.iota {dimensions = array<i32: 0>} : vector<128x1xi32>
    %15 = vector.broadcast %2 : i32 to vector<128x1xi32>
    %16 = arith.addi %14, %15 : vector<128x1xi32>
    %c300_i32 = arith.constant 300 : i32
    %17 = vector.broadcast %c300_i32 : i32 to vector<128x1xi32>
    %18 = arith.cmpi slt, %16, %17 : vector<128x1xi32>
    %cst_7 = arith.constant 0.000000e+00 : f32
    %19 = vector.shape_cast %18 : vector<128x1xi1> to vector<128x1xi1>
    %20 = vector.broadcast %19 : vector<128x1xi1> to vector<128x128xi1>
    %21 = vector.broadcast %cst_7 : f32 to vector<128x128xf32>
    %22 = arith.select %20, %13, %21 : vector<128x128xi1>, vector<128x128xf32>
    %23 = arith.truncf %22 : vector<128x128xf32> to vector<128x128xbf16>
    %c0_8 = arith.constant 0 : index
    %c0_9 = arith.constant 0 : index
    %24 = vector.load %arg5[%c0_8, %c0_9] : memref<128x256xbf16, #tpu.memory_space<vmem>>, vector<128x256xbf16>
    %cst_10 = arith.constant dense<0.000000e+00> : vector<128x256xf32>
    %25 = tpu.matmul %23, %24, %cst_10 {dimension_numbers = #tpu.dot_dimension_numbers<[1], [0], [0], [1], [0, 0, 1, 1], [], []>} : vector<128x128xbf16>, vector<128x256xbf16>, vector<128x256xf32> -> vector<128x256xf32>
    %c0_11 = arith.constant 0 : index
    %c0_12 = arith.constant 0 : index
    %26 = vector.load %arg6[%c0_11, %c0_12] : memref<1x256xf32, #tpu.memory_space<vmem>>, vector<1x256xf32>
    %27 = vector.broadcast %26 : vector<1x256xf32> to vector<128x256xf32>
    %28 = arith.addf %25, %27 : vector<128x256xf32>
    %29 = arith.truncf %28 : vector<128x256xf32> to vector<128x256xbf16>
    %30 = math.tanh %29 : vector<128x256xbf16>
    %31 = vector.extract_strided_slice %30 {offsets = [0, 0], sizes = [128, 128], strides = [1, 1]} : vector<128x256xbf16> to vector<128x128xbf16>
    %32 = vector.extract_strided_slice %30 {offsets = [0, 128], sizes = [128, 128], strides = [1, 1]} : vector<128x256xbf16> to vector<128x128xbf16>
    %cst_13 = arith.constant 5.000000e-01 : bf16
    %33 = vector.broadcast %cst_13 : bf16 to vector<128x128xbf16>
    %34 = arith.mulf %32, %33 : vector<128x128xbf16>
    %cst_14 = arith.constant 5.000000e-01 : bf16
    %35 = vector.broadcast %cst_14 : bf16 to vector<128x128xbf16>
    %36 = arith.addf %34, %35 : vector<128x128xbf16>
    %37 = arith.mulf %31, %36 : vector<128x128xbf16>
    %c0_15 = arith.constant 0 : index
    %c0_16 = arith.constant 0 : index
    %38 = vector.load %arg7[%c0_15, %c0_16] : memref<1x128xf32, #tpu.memory_space<vmem>>, vector<1x128xf32>
    %39 = arith.extf %37 : vector<128x128xbf16> to vector<128x128xf32>
    %40 = vector.broadcast %38 : vector<1x128xf32> to vector<128x128xf32>
    %41 = arith.mulf %39, %40 : vector<128x128xf32>
    %cst_17 = arith.constant dense<0.000000e+00> : vector<128xf32>
    %42 = vector.multi_reduction <add>, %41, %cst_17 [1] : vector<128x128xf32> to vector<128xf32>
    %43 = vector.shape_cast %42 : vector<128xf32> to vector<128x1xf32>
    %c0_18 = arith.constant 0 : index
    %c0_19 = arith.constant 0 : index
    %44 = vector.load %arg8[%c0_18, %c0_19] : memref<1x1xf32, #tpu.memory_space<vmem>>, vector<1x1xf32>
    %45 = vector.broadcast %44 : vector<1x1xf32> to vector<128x1xf32>
    %46 = arith.addf %43, %45 : vector<128x1xf32>
    %47 = tpu.transpose %46, [1, 0] : vector<128x1xf32> -> vector<1x128xf32>
    %c0_20 = arith.constant 0 : index
    %c0_21 = arith.constant 0 : index
    %48 = vector.load %arg9[%c0_20, %c0_21] : memref<1x128xf32, #tpu.memory_space<vmem>>, vector<1x128xf32>
    tpu.vector_store %arg9[%c0_20, %c0_21], %47 {strides = array<i32>} : memref<1x128xf32, #tpu.memory_space<vmem>>, vector<1x128xf32>,
    %49 = tpu.iota {dimensions = array<i32: 1>} : vector<1x128xi32>
    %50 = vector.broadcast %2 : i32 to vector<1x128xi32>
    %51 = arith.addi %49, %50 : vector<1x128xi32>
    %c300_i32_22 = arith.constant 300 : i32
    %52 = vector.broadcast %c300_i32_22 : i32 to vector<1x128xi32>
    %53 = arith.cmpi slt, %51, %52 : vector<1x128xi32>
    %cst_23 = arith.constant -1.000000e+30 : f32
    %54 = vector.broadcast %cst_23 : f32 to vector<1x128xf32>
    %55 = arith.select %53, %47, %54 : vector<1x128xi1>, vector<1x128xf32>
    %c0_24 = arith.constant 0 : index
    %c0_25 = arith.constant 0 : index
    %56 = vector.load %arg13[%c0_24, %c0_25] : memref<1x1xf32, #tpu.memory_space<vmem>>, vector<1x1xf32>
    %cst_26 = arith.constant dense<0xFF800000> : vector<1xf32>
    %57 = vector.multi_reduction <maximumf>, %55, %cst_26 [1] : vector<1x128xf32> to vector<1xf32>
    %58 = vector.shape_cast %57 : vector<1xf32> to vector<1x1xf32>
    %59 = arith.maximumf %56, %58 : vector<1x1xf32>
    %60 = arith.subf %56, %59 : vector<1x1xf32>
    %61 = math.exp %60 : vector<1x1xf32>
    %62 = vector.broadcast %59 : vector<1x1xf32> to vector<1x128xf32>
    %63 = arith.subf %55, %62 : vector<1x128xf32>
    %64 = math.exp %63 : vector<1x128xf32>
    %c0_27 = arith.constant 0 : index
    %c0_28 = arith.constant 0 : index
    %65 = vector.load %arg14[%c0_27, %c0_28] : memref<1x1xf32, #tpu.memory_space<vmem>>, vector<1x1xf32>
    %66 = arith.mulf %61, %65 : vector<1x1xf32>
    %cst_29 = arith.constant dense<0.000000e+00> : vector<1xf32>
    %67 = vector.multi_reduction <add>, %64, %cst_29 [1] : vector<1x128xf32> to vector<1xf32>
    %68 = vector.shape_cast %67 : vector<1xf32> to vector<1x1xf32>
    %69 = arith.addf %66, %68 : vector<1x1xf32>
    %c0_30 = arith.constant 0 : index
    %c0_31 = arith.constant 0 : index
    %70 = vector.load %arg14[%c0_30, %c0_31] : memref<1x1xf32, #tpu.memory_space<vmem>>, vector<1x1xf32>
    tpu.vector_store %arg14[%c0_30, %c0_31], %69 {strides = array<i32>} : memref<1x1xf32, #tpu.memory_space<vmem>>, vector<1x1xf32>,
    %c0_32 = arith.constant 0 : index
    %c0_33 = arith.constant 0 : index
    %71 = vector.load %arg15[%c0_32, %c0_33] : memref<1x128xf32, #tpu.memory_space<vmem>>, vector<1x128xf32>
    %72 = vector.broadcast %61 : vector<1x1xf32> to vector<1x128xf32>
    %73 = arith.mulf %72, %71 : vector<1x128xf32>
    %74 = arith.truncf %64 : vector<1x128xf32> to vector<1x128xbf16>
    %cst_34 = arith.constant dense<0.000000e+00> : vector<1x128xf32>
    %75 = tpu.matmul %74, %23, %cst_34 {dimension_numbers = #tpu.dot_dimension_numbers<[1], [0], [0], [1], [0, 0, 1, 1], [], []>} : vector<1x128xbf16>, vector<128x128xbf16>, vector<1x128xf32> -> vector<1x128xf32>
    %76 = arith.addf %73, %75 : vector<1x128xf32>
    %c0_35 = arith.constant 0 : index
    %c0_36 = arith.constant 0 : index
    %77 = vector.load %arg15[%c0_35, %c0_36] : memref<1x128xf32, #tpu.memory_space<vmem>>, vector<1x128xf32>
    tpu.vector_store %arg15[%c0_35, %c0_36], %76 {strides = array<i32>} : memref<1x128xf32, #tpu.memory_space<vmem>>, vector<1x128xf32>,
    %c0_37 = arith.constant 0 : index
    %c0_38 = arith.constant 0 : index
    %78 = vector.load %arg13[%c0_37, %c0_38] : memref<1x1xf32, #tpu.memory_space<vmem>>, vector<1x1xf32>
    tpu.vector_store %arg13[%c0_37, %c0_38], %59 {strides = array<i32>} : memref<1x1xf32, #tpu.memory_space<vmem>>, vector<1x1xf32>,
    %c1_i32 = arith.constant 1 : i32
    %79 = arith.cmpi eq, %arg1, %c1_i32 : i32
    %80 = arith.extui %79 : i1 to i32
    %c0_i32_39 = arith.constant 0 : i32
    %81 = arith.cmpi ne, %80, %c0_i32_39 : i32
    scf.if %81 {
      %c0_40 = arith.constant 0 : index
      %c0_41 = arith.constant 0 : index
      %82 = vector.load %arg13[%c0_40, %c0_41] : memref<1x1xf32, #tpu.memory_space<vmem>>, vector<1x1xf32>
      %c0_42 = arith.constant 0 : index
      %c0_43 = arith.constant 0 : index
      %c0_44 = arith.constant 0 : index
      %83 = vector.load %arg10[%c0_42, %c0_43, %c0_44] : memref<1x1x1xf32, #tpu.memory_space<vmem>>, vector<1x1x1xf32>
      %84 = vector.shape_cast %83 : vector<1x1x1xf32> to vector<1x1xf32>
      %85 = vector.shape_cast %82 : vector<1x1xf32> to vector<1x1x1xf32>
      tpu.vector_store %arg10[%c0_42, %c0_43, %c0_44], %85 {strides = array<i32>} : memref<1x1x1xf32, #tpu.memory_space<vmem>>, vector<1x1x1xf32>,
      %c0_45 = arith.constant 0 : index
      %c0_46 = arith.constant 0 : index
      %86 = vector.load %arg14[%c0_45, %c0_46] : memref<1x1xf32, #tpu.memory_space<vmem>>, vector<1x1xf32>
      %c0_47 = arith.constant 0 : index
      %c0_48 = arith.constant 0 : index
      %c0_49 = arith.constant 0 : index
      %87 = vector.load %arg11[%c0_47, %c0_48, %c0_49] : memref<1x1x1xf32, #tpu.memory_space<vmem>>, vector<1x1x1xf32>
      %88 = vector.shape_cast %87 : vector<1x1x1xf32> to vector<1x1xf32>
      %89 = vector.shape_cast %86 : vector<1x1xf32> to vector<1x1x1xf32>
      tpu.vector_store %arg11[%c0_47, %c0_48, %c0_49], %89 {strides = array<i32>} : memref<1x1x1xf32, #tpu.memory_space<vmem>>, vector<1x1x1xf32>,
      %c0_50 = arith.constant 0 : index
      %c0_51 = arith.constant 0 : index
      %90 = vector.load %arg15[%c0_50, %c0_51] : memref<1x128xf32, #tpu.memory_space<vmem>>, vector<1x128xf32>
      %c0_52 = arith.constant 0 : index
      %c0_53 = arith.constant 0 : index
      %c0_54 = arith.constant 0 : index
      %91 = vector.load %arg12[%c0_52, %c0_53, %c0_54] : memref<1x1x128xf32, #tpu.memory_space<vmem>>, vector<1x1x128xf32>
      %92 = vector.shape_cast %91 : vector<1x1x128xf32> to vector<1x128xf32>
      %93 = vector.shape_cast %90 : vector<1x128xf32> to vector<1x1x128xf32>
      tpu.vector_store %arg12[%c0_52, %c0_53, %c0_54], %93 {strides = array<i32>} : memref<1x1x128xf32, #tpu.memory_space<vmem>>, vector<1x1x128xf32>,
    } else {
    }
    return
  }
  func.func @transform_0(%arg0: i32, %arg1: i32) -> (i32, i32) {
    %c2_i32 = arith.constant 2 : i32
    %0 = arith.muli %arg0, %c2_i32 : i32
    %1 = arith.addi %0, %arg1 : i32
    %c2_i32_0 = arith.constant 2 : i32
    %2 = arith.minsi %1, %c2_i32_0 : i32
    %c0_i32 = arith.constant 0 : i32
    %c0_i32_1 = arith.constant 0 : i32
    return %2, %c0_i32 : i32, i32
  }
  func.func @transform_1(%arg0: i32, %arg1: i32) -> (i32, i32) {
    %c0_i32 = arith.constant 0 : i32
    %c0_i32_0 = arith.constant 0 : i32
    %c0_i32_1 = arith.constant 0 : i32
    return %c0_i32, %c0_i32_0 : i32, i32
  }
  func.func @transform_2(%arg0: i32, %arg1: i32) -> (i32, i32) {
    %c0_i32 = arith.constant 0 : i32
    %c0_i32_0 = arith.constant 0 : i32
    %c0_i32_1 = arith.constant 0 : i32
    return %c0_i32, %c0_i32_0 : i32, i32
  }
  func.func @transform_3(%arg0: i32, %arg1: i32) -> (i32, i32) {
    %c0_i32 = arith.constant 0 : i32
    %c0_i32_0 = arith.constant 0 : i32
    %c0_i32_1 = arith.constant 0 : i32
    return %c0_i32, %c0_i32_0 : i32, i32
  }
  func.func @transform_4(%arg0: i32, %arg1: i32) -> (i32, i32) {
    %c0_i32 = arith.constant 0 : i32
    %c0_i32_0 = arith.constant 0 : i32
    %c0_i32_1 = arith.constant 0 : i32
    return %c0_i32, %c0_i32_0 : i32, i32
  }
  func.func @transform_5(%arg0: i32, %arg1: i32) -> (i32, i32) {
    %c0_i32 = arith.constant 0 : i32
    %c0_i32_0 = arith.constant 0 : i32
    %c0_i32_1 = arith.constant 0 : i32
    return %c0_i32, %c0_i32_0 : i32, i32
  }
  func.func @transform_6(%arg0: i32, %arg1: i32) -> (i32, i32) {
    %c0_i32 = arith.constant 0 : i32
    %c0_i32_0 = arith.constant 0 : i32
    %c0_i32_1 = arith.constant 0 : i32
    return %c0_i32, %c0_i32_0 : i32, i32
  }
  func.func @transform_7(%arg0: i32, %arg1: i32) -> (i32, i32) {
    %c2_i32 = arith.constant 2 : i32
    %0 = arith.muli %arg0, %c2_i32 : i32
    %1 = arith.addi %0, %arg1 : i32
    %c0_i32 = arith.constant 0 : i32
    %c0_i32_0 = arith.constant 0 : i32
    return %c0_i32, %1 : i32, i32
  }
  func.func @transform_8(%arg0: i32, %arg1: i32) -> (i32, i32, i32) {
    %c0_i32 = arith.constant 0 : i32
    %c0_i32_0 = arith.constant 0 : i32
    %c0_i32_1 = arith.constant 0 : i32
    return %arg0, %c0_i32, %c0_i32_0 : i32, i32, i32
  }
  func.func @transform_9(%arg0: i32, %arg1: i32) -> (i32, i32, i32) {
    %c0_i32 = arith.constant 0 : i32
    %c0_i32_0 = arith.constant 0 : i32
    %c0_i32_1 = arith.constant 0 : i32
    return %arg0, %c0_i32, %c0_i32_0 : i32, i32, i32
  }
  func.func @transform_10(%arg0: i32, %arg1: i32) -> (i32, i32, i32) {
    %c0_i32 = arith.constant 0 : i32
    %c0_i32_0 = arith.constant 0 : i32
    %c0_i32_1 = arith.constant 0 : i32
    return %arg0, %c0_i32, %c0_i32_0 : i32, i32, i32
  }
}

</mosaic_0001>

<bundles_post_ra>
// kernel: tpu_custom_call.1
= control target key start
LH: loop header
LB: loop body
LE: loop exit
PB: predicated region body
PF: predicated region fallthrough
CT: control target
= control target key end

     0   :  { %s3077_s0 = inlined_call_operand.hbm [shape: bf16[300,256], index: 0, kind: input, shape index: {}]   ;;  %s3078_s1 = inlined_call_operand.hbm [shape: bf16[256,128], index: 1, kind: input, shape index: {}]   ;;  %s3079_s2 = inlined_call_operand.vmem [shape: f32[1,128], index: 2, kind: input, shape index: {}]   ;;  %s3080_s3 = inlined_call_operand.hbm [shape: bf16[128,256], index: 3, kind: input, shape index: {}]   ;;  %s3081_s4 = inlined_call_operand.vmem [shape: f32[1,256], index: 4, kind: input, shape index: {}]   ;;  %s3082_s5 = inlined_call_operand.vmem [shape: f32[1,128], index: 5, kind: input, shape index: {}]   ;;  %s3083_s6 = inlined_call_operand.<no memory space> [shape: f32[1,1], index: 6, kind: input, shape index: {}]   ;;  %s3084_s7 = inlined_call_operand.hbm [shape: f32[1,512], index: 7, kind: output, shape index: {0}]   ;;  %s3085_s8 = inlined_call_operand.vmem [shape: f32[2,1,1], index: 8, kind: output, shape index: {1}]   ;;  %s3086_s9 = inlined_call_operand.vmem [shape: f32[2,1,1], index: 9, kind: output, shape index: {2}]   ;;  %s3087_s10 = inlined_call_operand.hbm [shape: f32[2,1,128], index: 10, kind: output, shape index: {3}]  }
   0x1   :  { %3106 = sst [smem:[#allocation32_spill]] %s3079_s2  ;;  %v16_v0 = vstv %s3083_s6 }
   0x2   :  { %3107 = sst [smem:[#allocation33_spill]] %s3081_s4  ;;  %17 = vst [vmem:[#allocation5] sm:$0x1] %v16_v0 }
   0x3   :  { %3108 = sst [smem:[#allocation34_spill]] %s3082_s5 }
   0x4   :  { %3109 = sst [smem:[#allocation35_spill]] %s3084_s7 }
   0x5   :  { %3110 = sst [smem:[#allocation36_spill]] %s3085_s8 }
   0x6   :  { %3111 = sst [smem:[#allocation37_spill]] %s3086_s9 }
   0x7   :  { %3112 = sst [smem:[#allocation38_spill]] %s3087_s10 }
   0x8   :  { %18 = vsyncpa [#allocation7], 0 }
   0x9   :  { %20 = vsyncpa [#allocation7 + $0x1], 0 }
   0xa   :  { %21 = vsyncpa [#allocation10], 0 }
   0xb   :  { %22 = vsyncpa [#allocation8], 0 }
   0xc   :  { %24 = vsyncpa [#allocation8 + $0x1], 0 }
   0xd   :  { %25 = vsyncpa [#allocation14], 0 }
   0xe   :  { %27 = vsyncpa [#allocation14 + $0x1], 0  ;;  %s2485_s15 = smov 0   ;;  %s2487_s16 = smov 0  }
   0xf   :  { %s2489_s17 = smov 0   ;;  %s2491_s18 = smov 0  }
  0x10   :  { %s2493_s19 = smov 0   ;;  %s2495_s20 = smov 0  }
  0x11   :  { %s2497_s6 = smov 0   ;;  %s2499_s21 = smov 0  }
  0x12   :  { %s2501_s22 = smov 0   ;;  %s2503_s23 = smov 0  }
  0x13   :  { %s2505_s24 = smov 0   ;;  %s2507_s25 = smov 0  }
  0x14   :  { %s2509_s26 = smov 0   ;;  %s2511_s27 = smov 0  }
  0x15 LB: > { %3113 = sst [smem:[#allocation19_spill]] %s2357_s15  ;;  %s1656_s28 = sadd.s32 4294967295, %s2409_s27   ;;  %s2409_s27 = sphi %s2511_s27, %s33_s27   ;;  %s2405_s26 = sphi %s2509_s26, %s3167_s26   ;;  %s2401_s25 = sphi %s2507_s25, %s3166_s25   ;;  %s2397_s24 = sphi %s2505_s24, %s3165_s24   ;;  %s2393_s23 = sphi %s2503_s23, %s3176_s23   ;;  %s2389_s22 = sphi %s2501_s22, %s3175_s22   ;;  %s2385_s21 = sphi %s2499_s21, %s3174_s21   ;;  %s2381_s6 = sphi %s2497_s6, %s3173_s6   ;;  %s2377_s20 = sphi %s2495_s20, %s3162_s20   ;;  %s2373_s19 = sphi %s2493_s19, %s3172_s19   ;;  %s2369_s18 = sphi %s2491_s18, %s3171_s18   ;;  %s2365_s17 = sphi %s2489_s17, %s3160_s17   ;;  %s2361_s16 = sphi %s2487_s16, %s3170_s16   ;;  %s2357_s15 = sphi %s2485_s15, %s3169_s15  }
  0x16   : > { %3114 = sst [smem:[#allocation20_spill]] %s2365_s17  ;;  %s42_s30 = sadd.s32 1, %s2401_s25 }
  0x17   : > { %3115 = sst [smem:[#allocation21_spill]] %s2369_s18  ;;  %s45_s11 = sadd.s32 1, %s2405_s26 }
  0x18   : > { %3116 = sst [smem:[#allocation22_spill]] %s2377_s20  ;;  %p43_p0 = scmp.ge.s32.totalorder %s42_s30, 2 }
  0x19   : > { %3117 = sst [smem:[#allocation23_spill]] %s2401_s25  ;;  %s1658_s12 = sshll.u32 %s2405_s26, 1 }
  0x1a   : > { %3118 = sst [smem:[#allocation24_spill]] %s2405_s26  ;;  %s50_s13 = sadd.s32 %s2401_s25, %s1658_s12 }
  0x1b   : > { %s60_s14 = sadd.s32 1, %s2389_s22  ;;  %s3178_s30 = smov (%p43_p0, %s42_s30), 0 }
  0x1c   : > { %3119 = sst [smem:[#allocation25_spill]] %s3178_s30  ;;  %s3180_s11 = smov (!%p43_p0, %s45_s11), %s2405_s26 }
  0x1d   : > { %p51_p1 = scmp.lt.s32.totalorder %s50_s13, 2  ;;  %p67_p2 = scmp.ne.s32.totalorder %s2389_s22, %s2385_s21 }
  0x1e   : > { %p47_p3 = scmp.ge.s32.totalorder %s3180_s11, 2  ;;  %p68_p4 = scmp.eq.s32.totalorder %s2409_s27, 0 }
  0x1f   : > { %s2568_s29 = scalar_select %p51_p1, %s50_s13, 2 }
  0x20   : > { %s3182_s11 = smov (%p47_p3, %s3180_s11), 0  ;;  %p2572_p5 = por %p68_p4, %p67_p2 }
  0x21   : > { %3120 = sst [smem:[#allocation26_spill]] %s3182_s11  ;;  %p73_p6 = scmp.ne.s32.totalorder %s2385_s21, %s2381_s6 }
  0x22   : > { %s3121_s12 = scalar_select %p2572_p5, 1, 0 }
  0x23   : > { %s1659_s25 = sshll.u32 %s3182_s11, 1  ;;  %p2579_p7 = scmp.eq.s32.totalorder %s1656_s28, 0 }
  0x24   : > { %s54_s7 = sadd.s32 %s1659_s25, %s3178_s30  ;;  %s216_s5 = sadd.s32 1, %s2377_s20 }
  0x25   : > { %s3122_s10 = scalar_select %p2579_p7, 1, 0 }
  0x26   : > { %p55_p8 = scmp.lt.s32.totalorder %s54_s7, 2  ;;  %p2587_p9 = por %p2579_p7, %p73_p6 }
  0x27   : > { %s213_s6 = ssub.s32 %s50_s13, %s54_s7  ;;  %p226_p10 = scmp.ne.s32.totalorder %s2377_s20, %s2373_s19 }
  0x28   : > { %s3123_s4 = scalar_select %p2587_p9, 1, 0 }
  0x29   : > { %s3184_s7 = smov (!%p55_p8, %s54_s7), 2  ;;  %p214_p11 = scmp.eq.s32.totalorder %s213_s6, 0 }
  0x2a   : > { %p2593_p12 = scmp.eq.s32.totalorder %s1656_s28, 3  ;;  %s57_s30 = ssub.s32 %s2568_s29, %s3184_s7 }
  0x2b   : > { %p232_p13 = scmp.ne.s32.totalorder %s2373_s19, %s2369_s18  ;;  %p58_p0 = scmp.eq.s32.totalorder %s57_s30, 0 }
  0x2c   : > { %p2602_p1 = por %p2593_p12, %p226_p10  ;;  %s3128_s28 = sadd.s32 4294967294, %s2409_s27  }
  0x2d   : > { %s2607_s2 = scalar_select %p214_p11, %s2377_s20, %s216_s5  }
  0x2e   : > { %s3125_s13 = scalar_select %p2602_p1, 1, 0 }
  0x2f   : > { %3126 = sst [smem:[#allocation27_spill]] %s2607_s2  ;;  %p233_p2 = scmp.eq.s32.totalorder %s3128_s28, 3 }
  0x30   : > { %s2610_s6 = scalar_select %p58_p0, %s2389_s22, %s60_s14  }
  0x31   : > { %s291_s9 = ssub.s32 %s2405_s26, %s3182_s11  ;;  %s294_s8 = sadd.s32 1, %s2365_s17 }
  0x32   : > { %3127 = sst [smem:[#allocation28_spill]] %s2610_s6  ;;  %p292_p3 = scmp.eq.s32.totalorder %s291_s9, 0 }
  0x33   : > { %p2617_p4 = por %p233_p2, %p232_p13  ;;  %p304_p6 = scmp.ne.s32.totalorder %s2365_s17, %s2361_s16 }
  0x34   : > { %s2624_s30 = scalar_select %p292_p3, %s2365_s17, %s294_s8  }
  0x35   : > { %s3129_s7 = scalar_select %p2617_p4, 1, 0 }
  0x36   : > { %3131 = sst [smem:[#allocation30_spill]] %s2624_s30  ;;  %p2628_p8 = por %p304_p6, %p2593_p12 }
  0x37   : > { %3130 = sst [smem:[#allocation29_spill]] %s3129_s7  ;;  %p310_p10 = scmp.ne.s32.totalorder %s2361_s16, %s2357_s15 }
  0x38   : > { %s3132_s18 = scalar_select %p2628_p8, 1, 0 }
  0x39   : > { %p1662_p11 = scmp.ge.s32.totalorder %s2409_s27, 1  ;;  %p318_p0 = scmp.lt.s32.totalorder %s2409_s27, 5 }
  0x3a   : > { %p2636_p1 = por %p310_p10, %p233_p2  ;;  %s2411_s14 = smov [#allocation9]  }
  0x3b   : > { %p2640_p9 = pnand %p1662_p11, %p318_p0  ;;  %s330_s8 = sshll.u32 %s2411_s14, 4  ;;  %s331_s8 = int_to_ptr.vmem [resolvable:$true] %s330_s8 }
  0x3c   : > { %s3133_s5 = scalar_select %p2636_p1, 1, 0 }
  0x3d   : > { %s3135_s9 = scalar_select %p2640_p9, 1, 0 }
  0x3e   : > { %3134 = sst [smem:[#allocation31_spill]] %s3133_s5  ;;  %p1897_p13 = pneg %p2640_p9 }
  0x3f   : > { %s2412_s28 = smov [#allocation11]   ;;  %s2143_s2 = scalar_lea.hbm %s3078_s1, 2048 }
  0x40   : > { %p2648_p12 = pnand %p1897_p13, %p2579_p7  ;;  %s346_s11 = sshll.u32 %s2412_s28, 4  ;;  %s2652_s11 = int_to_ptr.vmem [resolvable:$true] %s346_s11 }
  0x41   : > { %p2144_p2 = scmp.ne.s32.totalorder %s3078_s1, %s2143_s2  ;;  %p2150_p11 = scmp.lt.u32.totalorder %s2143_s2, %s3078_s1 }
  0x42   : > { %p2145_p3 = pneg %p2648_p12 }
  0x44   : > { %p2146_p6 = pnand %p2145_p3, %p2144_p2 }
  0x46   : > { %p2147_p10 = pneg %p2146_p6 }
  0x48   : > { %p2152_p0 = pnand %p2150_p11, %p2147_p10 }
  0x4a   : > { %2155 = shalt.err (!%p2152_p0)
}
  0x4b   : > { %s2156_s28 = scalar_lea.vmem %s331_s8, 2048  ;;  %p2164_p8 = scmp.lt.s32.totalorder %s331_s8, %s331_s8 }
  0x4c   : > { %p2157_p13 = scmp.ne.s32.totalorder %s331_s8, %s2156_s28  ;;  %p2165_p7 = scmp.lt.s32.totalorder %s2156_s28, %s2156_s28 }
  0x4e   : > { %p2159_p1 = pnand %p2157_p13, %p2145_p3  ;;  %p2166_p9 = por %p2165_p7, %p2164_p8 }
  0x50   : > { %p2160_p4 = pneg %p2159_p1 }
  0x52   : > { %p2167_p5 = pnand %p2166_p9, %p2160_p4 }
  0x54   : > { %2170 = shalt.err (!%p2167_p5)
}
  0x55   : > { %s2413_s20 = smov 64   ;;  %s2414_s26 = smov 4  }
  0x56   : > { %1900 = dma.hbm_to_vmem [thread:$0]  (!%p2648_p12), %s3078_s1, 2048, %s331_s8, [#allocation10], %s2413_s20, %s2413_s20, %s2414_s26  }
  0x57   : > { %s2171_s14 = scalar_lea.hbm %s3080_s3, 2048 }
  0x58   : > { %p2172_p1 = scmp.ne.s32.totalorder %s3080_s3, %s2171_s14  ;;  %p2178_p9 = scmp.lt.u32.totalorder %s2171_s14, %s3080_s3 }
  0x5a   : > { %p2174_p5 = pnand %p2172_p1, %p2145_p3 }
  0x5c   : > { %p2175_p7 = pneg %p2174_p5 }
  0x5e   : > { %p2180_p4 = pnand %p2178_p9, %p2175_p7 }
  0x60   : > { %2183 = shalt.err (!%p2180_p4)
}
  0x61   : > { %s2184_s8 = scalar_lea.vmem %s2652_s11, 2048  ;;  %p2192_p10 = scmp.lt.s32.totalorder %s2652_s11, %s2652_s11 }
  0x62   : > { %p2185_p8 = scmp.ne.s32.totalorder %s2652_s11, %s2184_s8  ;;  %p2193_p11 = scmp.lt.s32.totalorder %s2184_s8, %s2184_s8 }
  0x64   : > { %p2187_p2 = pnand %p2185_p8, %p2145_p3  ;;  %p2194_p0 = por %p2193_p11, %p2192_p10 }
  0x66   : > { %p2188_p6 = pneg %p2187_p2 }
  0x68   : > { %p2195_p13 = pnand %p2194_p0, %p2188_p6 }
  0x6a   : > { %2198 = shalt.err (!%p2195_p13)
}
  0x6b   : > { %s2415_s15 = smov 128   ;;  %s2416_s7 = smov 8  }
  0x6c   : > { %1903 = dma.hbm_to_vmem [thread:$0]  (!%p2648_p12), %s3080_s3, 2048, %s2652_s11, [#allocation10], %s2415_s15, %s2415_s15, %s2416_s7  }
  0x6d   : > { %p1665_p1 = scmp.ge.s32.totalorder %s2409_s27, 4 }
  0x6e   : > { %p3137_p3 = scmp.ne.s32.totalorder (!%p1665_p1), %s3121_s12, 0 }
  0x6f   : > { %365 = sbr.rel (%p1665_p1) target bundleno = 153 (0x99), region = 40 }
  0x76   : > { %368 = sbr.rel (!%p3137_p3) target bundleno = 153 (0x99), region = 44  ;;  %s369_s26 = sand.u32 (%p3137_p3), 1, %s2389_s22  }
  0x77   : > { %s1668_s2 = sshll.u32 (%p3137_p3), %s2568_s29, 4  ;;  %s1666_s17 = sshll.u32 (%p3137_p3), %s369_s26, 7 }
  0x78   : > { %s379_s6 = ssub.s32 (%p3137_p3), 38, %s1668_s2  ;;  %s2709_s14 = scalar_lea.sflag (%p3137_p3), [#allocation7], %s369_s26 }
  0x79   : > { %p380_p5 = scmp.lt.s32.totalorder (%p3137_p3), %s379_s6, 16  ;;  %s373_s11 = scalar_lea.vmem (%p3137_p3), [#allocation6], %s1666_s17 }
  0x7d   : > { %s3186_s6 = smov (!%p380_p5, %s379_s6), 16 }
  0x7e   : > { %s2706_s30 = sshll.u32 %s3186_s6, 7 }
  0x7f   : > { %s385_s25 = ssub.s32 2048, %s2706_s30 }
  0x80   : > { %386 = vsyncadd %s2709_s14, %s385_s25  ;;  %p1671_p12 = scmp.ne.s32.totalorder %s2706_s30, 0  ;;  %s1790_s12 = sshll.u32 %s2568_s29, 11 }
  0x81   : > { %s2717_s15 = scalar_lea.hbm %s3077_s0, %s1790_s12  ;;  %s392_s7 = sshll.u32 %s373_s11, 4  ;;  %s2719_s7 = int_to_ptr.vmem [resolvable:$true] %s392_s7 }
  0x82   : > { %s2199_s5 = scalar_lea.hbm %s2717_s15, %s2706_s30  ;;  %s2203_s29 = scalar_lea.hbm %s3077_s0, 4864 }
  0x83   : > { %p2200_p7 = scmp.ne.s32.totalorder %s2717_s15, %s2199_s5  ;;  %p2204_p8 = scmp.lt.u32.totalorder %s2717_s15, %s3077_s0 }
  0x84   : > { %p2205_p2 = scmp.lt.u32.totalorder %s2203_s29, %s2199_s5  ;;  %p2207_p10 = scmp.lt.u32.totalorder %s2199_s5, %s2717_s15 }
  0x85   : > { %p2201_p9 = pnand %p2200_p7, %p1671_p12 }
  0x86   : > { %p2206_p6 = por %p2205_p2, %p2204_p8 }
  0x87   : > { %p2202_p4 = pneg %p2201_p9 }
  0x88   : > { %p2208_p11 = por %p2207_p10, %p2206_p6 }
  0x8a   : > { %p2209_p0 = pnand %p2208_p11, %p2202_p4 }
  0x8c   : > { %2212 = shalt.err (!%p2209_p0)
}
  0x8d   : > { %s2213_s6 = scalar_lea.vmem %s2719_s7, %s2706_s30  ;;  %s2417_s25 = smov [#allocation6]  }
  0x8e   : > { %p2214_p13 = scmp.ne.s32.totalorder %s2719_s7, %s2213_s6  ;;  %s2217_s11 = sshll.u32 %s2417_s25, 4  ;;  %s2218_s11 = int_to_ptr.vmem [resolvable:$false] %s2217_s11 }
  0x8f   : > { %s2219_s12 = scalar_lea.vmem %s2218_s11, 4096  ;;  %p2220_p5 = scmp.lt.s32.totalorder %s2719_s7, %s2218_s11 }
  0x90   : > { %p2215_p1 = pnand %p2214_p13, %p1671_p12  ;;  %p2221_p7 = scmp.lt.s32.totalorder %s2219_s12, %s2213_s6 }
  0x92   : > { %p2216_p3 = pneg %p2215_p1  ;;  %p2222_p9 = por %p2221_p7, %p2220_p5 }
  0x94   : > { %p2223_p8 = pnand %p2222_p9, %p2216_p3 }
  0x96   : > { %2226 = shalt.err (!%p2223_p8)
}
  0x97   : > { %s2418_s28 = smov 128   ;;  %s2419_s8 = smov 8  }
  0x98   : > { %398 = dma.hbm_to_vmem [thread:$0]  (%p1671_p12), %s2717_s15, %s2706_s30, %s2719_s7, %s2709_s14, %s2418_s28, %s2418_s28, %s2419_s8  }
  0x99 PF: > { %p3138_p4 = scmp.ne.s32.totalorder %s3135_s9, 0 }
  0x9a   : > { %s406_s5 = sand.u32 (!%p3138_p4), 1, %s2385_s21   ;;  %p3139_p2 = scmp.ne.s32.totalorder (!%p3138_p4), %s3123_s4, 0 }
  0x9b   : > { %404 = sbr.rel (%p3138_p4) target bundleno = 1518 (0x5ee), region = 48  ;;  %s1677_s20 = sshll.u32 (!%p3138_p4), %s406_s5, 7 }
  0x9c   : > { %s407_s26 = scalar_lea.sflag (!%p3138_p4), [#allocation7], %s406_s5  ;;  %s2749_s29 = scalar_lea.vmem (!%p3138_p4), [#allocation6], %s1677_s20 }
  0xa2   : > { %2340 = dma.done.wait (%p3139_p2), %s407_s26, 2048  }
  0xa3   : > { %2342 = vsyncadd (%p3139_p2), %s407_s26, 4294965248  ;;  %p3140_p6 = scmp.ne.s32.totalorder %s3122_s10, 0 }
  0xa5   : > { %2344 = dma.done.wait (%p3140_p6), [#allocation10], 4096  }
  0xa6   : > { %2346 = vsyncadd (%p3140_p6), [#allocation10], 4294963200  ;;  %s446_s9 = sand.u32 1, %s2373_s19   ;;  %s462_s30 = sand.u32 1, %s2361_s16  }
  0xa7   : > { %p476_p12 = scmp.lt.s32.totalorder %s2397_s24, 1  ;;  %s1680_s14 = sshll.u32 %s2397_s24, 1 }
  0xa8   : > { %s2764_s4 = sadd.s32 %s2393_s23, %s1680_s14  ;;  %s3141_s17 = sld [smem:[#allocation36_spill]] }
  0xa9   : > { %s2767_s15 = scalar_select %p476_p12, %s2397_s24, 1 }
  0xaa   : > { %s1681_s10 = sshll.u32 %s2764_s4, 7  ;;  %s3142_s12 = sld [smem:[#allocation37_spill]] }
  0xab   : > { %s2780_s8 = scalar_lea.vmem [#allocation12], %s446_s9  ;;  %s2784_s5 = scalar_lea.vmem [#allocation13], %s462_s30 }
  0xac   : > { %p1682_p10 = scmp.ne.s32.totalorder %s2393_s23, 0 }
  0xad   : > { %vm491_vm0 = vcmask (!%p1682_p10), 0   ;;  %v2420_v1 = vmov (!%p1682_p10), -1e+30   ;;  %v2421_v2 = vmov (!%p1682_p10), 0.0  }
  0xae   : > { %s478_s6 = scalar_lea.vmem %s3141_s17, %s2767_s15  ;;  %490 = sbr.rel (%p1682_p10) target bundleno = 181 (0xb5), region = 64  ;;  %492 = vst.msk [vmem:[#allocation2] sm:$0x1] (!%p1682_p10), %vm491_vm0, %v2420_v1  ;;  %493 = vst.msk [vmem:[#allocation3] sm:$0x1] (!%p1682_p10), %vm491_vm0, %v2421_v2 }
  0xaf   : > { %494 = vst [vmem:[#allocation4] sm:$0x1] (!%p1682_p10), %v2421_v2 }
  0xb0   : > { %s481_s28 = scalar_lea.vmem %s3142_s12, %s2767_s15 }
  0xb5 PF: > { %v2043_v3 = vld [vmem:[#allocation9 + $0x40] sm:$0xff]   ;;  %v2045_v5 = vld [vmem:[#allocation9 + $0x48] sm:$0xff]   ;;  %v2047_v7 = vld [vmem:[#allocation9 + $0x50] sm:$0xff]   ;;  %v2422_v51 = vmov 0   ;;  %v2423_v52 = vmov 0.0   ;;  %v839_v53 = vlaneseq  ;;  %v2812_v56 = vstv %s1681_s10  ;;  %s3144_s7 = sld [smem:[#allocation33_spill]] }
  0xb6   : > { %v2044_v4 = vld [vmem:[#allocation9] sm:$0xff]   ;;  %1791 = vmatprep.subr.bf16.mxu0 %v2043_v3  ;;  %v2046_v6 = vld [vmem:[#allocation9 + $0x8] sm:$0xff]   ;;  %v2048_v8 = vld [vmem:[#allocation9 + $0x10] sm:$0xff]   ;;  %1085 = vmatprep.mubr.bf16.mxu1 %v2422_v51  ;;  %s3145_s25 = sld [smem:[#allocation34_spill]]  ;;  %p1782_p11 = scmp.ne.s32.totalorder %s2393_s23, 1 }
  0xb7   : > { %1792 = vmatpush3.bf16.msra.mxu0 %v2044_v4  ;;  %v2049_v9 = vld [vmem:[#allocation9 + $0x58] sm:$0xff]   ;;  %v2051_v11 = vld [vmem:[#allocation9 + $0x60] sm:$0xff]   ;;  %v2053_v13 = vld [vmem:[#allocation9 + $0x68] sm:$0xff]   ;;  %2041 = vset.pattern.permute.xlu1 %v2422_v51  ;;  %v2807_v54 = vshrl.u32 %v839_v53, 7 }
  0xb8   : > { %1793 = vmatprep.subr.bf16.mxu0 %v2045_v5  ;;  %v2050_v10 = vld [vmem:[#allocation9 + $0x18] sm:$0xff]   ;;  %v2052_v12 = vld [vmem:[#allocation9 + $0x20] sm:$0xff]   ;;  %v2054_v15 = vld [vmem:[#allocation9 + $0x28] sm:$0xff]  }
  0xb9   : > { %v2061_v14 = vld [vmem:[%s2749_s29 + $0x4] ss:$8 sps:$4 sm:$0xff]   ;;  %v2055_v16 = vld [vmem:[#allocation9 + $0x70] sm:$0xff]   ;;  %v2057_v18 = vld [vmem:[#allocation9 + $0x78] sm:$0xff]   ;;  %v841_v55 = vadd.s32 8, %v2807_v54  ;;  %v857_v60 = vadd.s32 %v2812_v56, %v2807_v54  ;;  %v842_v4 = vadd.s32 16, %v2807_v54 }
  0xba   : > { %758 = vmatprep.mubr.bf16.mxu0 %v2061_v14  ;;  %v2056_v17 = vld [vmem:[#allocation9 + $0x30] sm:$0xff]   ;;  %v2058_v19 = vld [vmem:[#allocation9 + $0x38] sm:$0xff]   ;;  %v2083_v20 = vld [vmem:[#allocation11 + $0x4] ss:$8 sps:$4 sm:$0xff]   ;;  %v843_v5 = vadd.s32 24, %v2807_v54 }
  0xbb   : > { %1794 = vmatpush3.bf16.msra.mxu0 %v2046_v6  ;;  %v2085_v21 = vld [vmem:[#allocation11] ss:$8 sps:$4 sm:$0xff]   ;;  %v2086_v22 = vld [vmem:[#allocation11 + $0x14] ss:$8 sps:$4 sm:$0xff]   ;;  %1053 = vmatprep.subr.bf16.mxu1 %v2083_v20  ;;  %v2088_v24 = vld [vmem:[#allocation11 + $0x10] ss:$8 sps:$4 sm:$0xff]   ;;  %v858_v63 = vadd.s32 %v2812_v56, %v841_v55 }
  0xbc   : > { %1795 = vmatprep.subr.bf16.mxu0 %v2047_v7  ;;  %v2059_v23 = vld [vmem:[%s2749_s29] ss:$8 sps:$4 sm:$0xff]   ;;  %1054 = vmatpush1.bf16.msra.mxu1 %v2085_v21  ;;  %v2062_v25 = vld [vmem:[%s2749_s29 + $0x14] ss:$8 sps:$4 sm:$0xff]   ;;  %v2089_v26 = vld [vmem:[#allocation11 + $0x24] ss:$8 sps:$4 sm:$0xff]   ;;  %v860_v14 = vadd.s32 %v2812_v56, %v843_v5 }
  0xbd   : > { %1055 = vmatprep.subr.bf16.mxu1 %v2086_v22  ;;  %v2091_v27 = vld [vmem:[#allocation11 + $0x20] ss:$8 sps:$4 sm:$0xff]   ;;  %v2092_v28 = vld [vmem:[#allocation11 + $0x34] ss:$8 sps:$4 sm:$0xff]   ;;  %v2064_v29 = vld [vmem:[%s2749_s29 + $0x10] ss:$8 sps:$4 sm:$0xff]  }
  0xbe   : > { %v2094_v30 = vld [vmem:[#allocation11 + $0x30] ss:$8 sps:$4 sm:$0xff]   ;;  %v2065_v31 = vld [vmem:[%s2749_s29 + $0x24] ss:$8 sps:$4 sm:$0xff]   ;;  %v2097_v33 = vld [vmem:[#allocation11 + $0x40] ss:$8 sps:$4 sm:$0xff]  }
  0xbf   : > { %1796 = vmatpush3.bf16.msra.mxu0 %v2048_v8  ;;  %v2095_v32 = vld [vmem:[#allocation11 + $0x44] ss:$8 sps:$4 sm:$0xff]   ;;  %v2067_v34 = vld [vmem:[%s2749_s29 + $0x20] ss:$8 sps:$4 sm:$0xff]   ;;  %v2068_v35 = vld [vmem:[%s2749_s29 + $0x34] ss:$8 sps:$4 sm:$0xff]  }
  0xc0   : > { %1797 = vmatprep.subr.bf16.mxu0 %v2049_v9  ;;  %1056 = vmatpush1.bf16.msra.mxu1 %v2088_v24  ;;  %v2070_v36 = vld [vmem:[%s2749_s29 + $0x30] ss:$8 sps:$4 sm:$0xff]   ;;  %v2071_v37 = vld [vmem:[%s2749_s29 + $0x44] ss:$8 sps:$4 sm:$0xff]   ;;  %v2073_v38 = vld [vmem:[%s2749_s29 + $0x40] ss:$8 sps:$4 sm:$0xff]  }
  0xc1   : > { %1057 = vmatprep.subr.bf16.mxu1 %v2089_v26  ;;  %v2074_v39 = vld [vmem:[%s2749_s29 + $0x54] ss:$8 sps:$4 sm:$0xff]   ;;  %v2076_v40 = vld [vmem:[%s2749_s29 + $0x50] ss:$8 sps:$4 sm:$0xff]   ;;  %v2077_v41 = vld [vmem:[%s2749_s29 + $0x64] ss:$8 sps:$4 sm:$0xff]  }
  0xc2   : > { %v2079_v42 = vld [vmem:[%s2749_s29 + $0x60] ss:$8 sps:$4 sm:$0xff]   ;;  %v2080_v43 = vld [vmem:[%s2749_s29 + $0x74] ss:$8 sps:$4 sm:$0xff]   ;;  %v2082_v44 = vld [vmem:[%s2749_s29 + $0x70] ss:$8 sps:$4 sm:$0xff]  }
  0xc3   : > { %1798 = vmatpush3.bf16.msra.mxu0 %v2050_v10  ;;  %v2098_v45 = vld [vmem:[#allocation11 + $0x54] ss:$8 sps:$4 sm:$0xff]   ;;  %v2100_v46 = vld [vmem:[#allocation11 + $0x50] ss:$8 sps:$4 sm:$0xff]   ;;  %v2101_v47 = vld [vmem:[#allocation11 + $0x64] ss:$8 sps:$4 sm:$0xff]  }
  0xc4   : > { %1799 = vmatprep.subr.bf16.mxu0 %v2051_v11  ;;  %1058 = vmatpush1.bf16.msra.mxu1 %v2091_v27  ;;  %v2103_v48 = vld [vmem:[#allocation11 + $0x60] ss:$8 sps:$4 sm:$0xff]   ;;  %v2104_v49 = vld [vmem:[#allocation11 + $0x74] ss:$8 sps:$4 sm:$0xff]   ;;  %v2106_v50 = vld [vmem:[#allocation11 + $0x70] ss:$8 sps:$4 sm:$0xff]  }
  0xc5   : > { %1059 = vmatprep.subr.bf16.mxu1 %v2092_v28  ;;  %s3143_s29 = sld [smem:[#allocation32_spill]]  ;;  %vm873_vm1 = vcmp.lt.s32.totalorder %v857_v60, 300  ;;  %vm874_vm2 = vcmp.lt.s32.totalorder %v858_v63, 300  ;;  %vm876_vm5 = vcmp.lt.s32.totalorder %v860_v14, 300  ;;  %v845_v20 = vadd.s32 40, %v2807_v54 }
  0xc6   : > { %vm1732_vm3 = vmpackc.low %vm874_vm2, %vm873_vm1 }
  0xc7   : > { %1800 = vmatpush3.bf16.msra.mxu0 %v2052_v12 }
  0xc8   : > { %1801 = vmatprep.subr.bf16.mxu0 %v2053_v13  ;;  %1060 = vmatpush1.bf16.msra.mxu1 %v2094_v30  ;;  %v859_v13 = vadd.s32 %v2812_v56, %v842_v4 }
  0xc9   : > { %1061 = vmatprep.subr.bf16.mxu1 %v2095_v32 }
  0xca   : > { %vm875_vm4 = vcmp.lt.s32.totalorder %v859_v13, 300 }
  0xcb   : > { %1802 = vmatpush3.bf16.msra.mxu0 %v2054_v15  ;;  %v2817_v58 = vld [vmem:[%s3143_s29] ss:$0 sm:$0xff]  ;;  %vm1735_vm6 = vmpackc.low %vm876_vm5, %vm875_vm4 }
  0xcc   : > { %1803 = vmatprep.subr.bf16.mxu0 %v2055_v16  ;;  %1062 = vmatpush1.bf16.msra.mxu1 %v2097_v33 }
  0xcd   : > { %1063 = vmatprep.subr.bf16.mxu1 %v2098_v45 }
  0xcf   : > { %1804 = vmatpush3.bf16.msra.mxu0 %v2056_v17 }
  0xd0   : > { %1805 = vmatprep.subr.bf16.mxu0 %v2057_v18  ;;  %1064 = vmatpush1.bf16.msra.mxu1 %v2100_v46  ;;  %v844_v18 = vadd.s32 32, %v2807_v54 }
  0xd1   : > { %1065 = vmatprep.subr.bf16.mxu1 %v2101_v47 }
  0xd3   : > { %1806 = vmatpush3.bf16.msra.mxu0 %v2058_v19 }
  0xd4   : > { %1066 = vmatpush1.bf16.msra.mxu1 %v2103_v48  ;;  %1864 = vmatprep.subr.bf16.mxu0 %v2423_v52  ;;  %v848_v48 = vadd.s32 64, %v2807_v54 }
  0xd5   : > { %1067 = vmatprep.subr.bf16.mxu1 %v2104_v49 }
  0xd6   : > { %759 = vmatmul.mubr.bf16.vlgmr.msra.gmra.mrb[0].mxu0 %v2059_v23 }
  0xd7   : > { %766 = vmatprep.mubr.bf16.mxu0 %v2062_v25  ;;  %v861_v25 = vadd.s32 %v2812_v56, %v844_v18 }
  0xd8   : > { %1068 = vmatpush1.bf16.msra.mxu1 %v2106_v50  ;;  %v849_v50 = vadd.s32 72, %v2807_v54 }
  0xd9   : > { %vm877_vm7 = vcmp.lt.s32.totalorder %v861_v25, 300 }
  0xde   : > { %767 = vmatmul.mubr.bf16.gmra.mrb[4].mxu0 %v2064_v29  ;;  %v862_v29 = vadd.s32 %v2812_v56, %v845_v20  ;;  %v852_v20 = vadd.s32 96, %v2807_v54 }
  0xdf   : > { %774 = vmatprep.mubr.bf16.mxu0 %v2065_v31 }
  0xe0   : > { %vm878_vm8 = vcmp.lt.s32.totalorder %v862_v29, 300 }
  0xe1   : > { %vm1738_vm9 = vmpackc.low %vm878_vm8, %vm877_vm7 }
  0xe6   : > { %775 = vmatmul.mubr.bf16.gmra.mrb[8].mxu0 %v2067_v34  ;;  %v846_v34 = vadd.s32 48, %v2807_v54 }
  0xe7   : > { %782 = vmatprep.mubr.bf16.mxu0 %v2068_v35  ;;  %v847_v35 = vadd.s32 56, %v2807_v54 }
  0xee   : > { %783 = vmatmul.mubr.bf16.gmra.mrb[12].mxu0 %v2070_v36 }
  0xef   : > { %790 = vmatprep.mubr.bf16.mxu0 %v2071_v37 }
  0xf6   : > { %791 = vmatmul.mubr.bf16.gmra.mrb[16].mxu0 %v2073_v38 }
  0xf7   : > { %798 = vmatprep.mubr.bf16.mxu0 %v2074_v39 }
  0xfe   : > { %799 = vmatmul.mubr.bf16.gmra.mrb[20].mxu0 %v2076_v40 }
  0xff   : > { %806 = vmatprep.mubr.bf16.mxu0 %v2077_v41 }
 0x106   : > { %807 = vmatmul.mubr.bf16.gmra.mrb[24].mxu0 %v2079_v42 }
 0x107   : > { %814 = vmatprep.mubr.bf16.mxu0 %v2080_v43  ;;  %v863_v43 = vadd.s32 %v2812_v56, %v846_v34 }
 0x109   : > { %vm879_vm10 = vcmp.lt.s32.totalorder %v863_v43, 300 }
 0x10e   : > { %815 = vmatmul.mubr.bf16.gmra.mrb[28].mxu0 %v2082_v44  ;;  %v864_v44 = vadd.s32 %v2812_v56, %v847_v35 }
 0x110   : > { %vm880_vm11 = vcmp.lt.s32.totalorder %v864_v44, 300 }
 0x111   : > { %vm1741_vm12 = vmpackc.low %vm880_vm11, %vm879_vm10  ;;  %vm1355_vm10 = vcmask 1040384   ;;  %vm1381_vm11 = vcmask 0  }
 0x1a9   : > { %v1807_v57 = vpop.f32.mrb[0].mxu0 }
 0x1aa   : > { %v1808_v59 = vpop.f32.mrb[1].mxu0 }
 0x1ab   : > { %v1809_v61 = vadd.f32 %v1808_v59, %v1807_v57  ;;  %v1810_v62 = vpop.f32.mrb[2].mxu0 }
 0x1ac   : > { %v1811_v0 = vpop.f32.mrb[3].mxu0 }
 0x1ad   : > { %v761_v1 = vadd.f32 %v1809_v61, %v2817_v58  ;;  %v1812_v2 = vadd.f32 %v1811_v0, %v1810_v62  ;;  %v865_v61 = vadd.s32 %v2812_v56, %v848_v48 }
 0x1af   : > { %v764_v3 = vadd.f32 %v1812_v2, %v2817_v58  ;;  %v823_v6 = vmax.f32 %v761_v1, 0.0  ;;  %v866_v1 = vadd.s32 %v2812_v56, %v849_v50  ;;  %vm881_vm13 = vcmp.lt.s32.totalorder %v865_v61, 300  ;;  %v961_v61 = vld [vmem:[%s3144_s7] sm:$0x3] }
 0x1b1   : > { %v824_v7 = vmax.f32 %v764_v3, 0.0  ;;  %v1813_v8 = vpop.f32.mrb[4].mxu0  ;;  %vm882_vm14 = vcmp.lt.s32.totalorder %v866_v1, 300 }
 0x1b2   : > { %v1814_v9 = vpop.f32.mrb[5].mxu0  ;;  %vm1744_vm15 = vmpackc.low %vm882_vm14, %vm881_vm13 }
 0x1b3   : > { %v1733_v10 = vpack.c.bf16 %v824_v7, %v823_v6  ;;  %v1815_v11 = vadd.f32 %v1814_v9, %v1813_v8  ;;  %v1816_v12 = vpop.f32.mrb[6].mxu0  ;;  %v850_v6 = vadd.s32 80, %v2807_v54  ;;  %v851_v7 = vadd.s32 88, %v2807_v54 }
 0x1b4   : > { %v1817_v15 = vpop.f32.mrb[7].mxu0 }
 0x1b5   : > { %v769_v16 = vadd.f32 %v1815_v11, %v2817_v58  ;;  %v1818_v17 = vadd.f32 %v1817_v15, %v1816_v12  ;;  %1734 = vmatmul.mubr.msk.bf16.vlgmr.msra.gmra.mrb[0].mxu1 %vm1732_vm3, %v1733_v10  ;;  %1865 = vmatpush3.bf16.msk.msra.mxu0 %vm1732_vm3, %v1733_v10  ;;  %v867_v15 = vadd.s32 %v2812_v56, %v850_v6 }
 0x1b6   : > { %1095 = vmatprep.mubr.bf16.mxu1 %v2422_v51  ;;  %1866 = vmatprep.subr.bf16.mxu0 %v2423_v52 }
 0x1b7   : > { %v772_v19 = vadd.f32 %v1818_v17, %v2817_v58  ;;  %v825_v21 = vmax.f32 %v769_v16, 0.0  ;;  %v868_v16 = vadd.s32 %v2812_v56, %v851_v7  ;;  %vm883_vm0 = vcmp.lt.s32.totalorder %v867_v15, 300 }
 0x1b9   : > { %v826_v22 = vmax.f32 %v772_v19, 0.0  ;;  %v1819_v23 = vpop.f32.mrb[8].mxu0  ;;  %vm884_vm1 = vcmp.lt.s32.totalorder %v868_v16, 300 }
 0x1ba   : > { %v1820_v24 = vpop.f32.mrb[9].mxu0  ;;  %vm1747_vm2 = vmpackc.low %vm884_vm1, %vm883_vm0 }
 0x1bb   : > { %v1736_v26 = vpack.c.bf16 %v826_v22, %v825_v21  ;;  %v1821_v27 = vadd.f32 %v1820_v24, %v1819_v23  ;;  %v1822_v28 = vpop.f32.mrb[10].mxu0  ;;  %v853_v22 = vadd.s32 104, %v2807_v54 }
 0x1bc   : > { %v1823_v30 = vpop.f32.mrb[11].mxu0 }
 0x1bd   : > { %v777_v31 = vadd.f32 %v1821_v27, %v2817_v58  ;;  %v1824_v32 = vadd.f32 %v1823_v30, %v1822_v28  ;;  %1737 = vmatmul.mubr.msk.bf16.gmra.mrb[4].mxu1 %vm1735_vm6, %v1736_v26  ;;  %1867 = vmatpush3.bf16.msk.msra.mxu0 %vm1735_vm6, %v1736_v26  ;;  %v869_v27 = vadd.s32 %v2812_v56, %v852_v20 }
 0x1be   : > { %1105 = vmatprep.mubr.bf16.mxu1 %v2422_v51  ;;  %1868 = vmatprep.subr.bf16.mxu0 %v2423_v52 }
 0x1bf   : > { %v780_v33 = vadd.f32 %v1824_v32, %v2817_v58  ;;  %v827_v36 = vmax.f32 %v777_v31, 0.0  ;;  %v870_v31 = vadd.s32 %v2812_v56, %v853_v22  ;;  %vm885_vm3 = vcmp.lt.s32.totalorder %v869_v27, 300 }
 0x1c1   : > { %v828_v37 = vmax.f32 %v780_v33, 0.0  ;;  %v1825_v38 = vpop.f32.mrb[12].mxu0  ;;  %vm886_vm4 = vcmp.lt.s32.totalorder %v870_v31, 300 }
 0x1c2   : > { %v1826_v39 = vpop.f32.mrb[13].mxu0  ;;  %vm1750_vm5 = vmpackc.low %vm886_vm4, %vm885_vm3 }
 0x1c3   : > { %v1739_v40 = vpack.c.bf16 %v828_v37, %v827_v36  ;;  %v1827_v41 = vadd.f32 %v1826_v39, %v1825_v38  ;;  %v1828_v42 = vpop.f32.mrb[14].mxu0  ;;  %v854_v36 = vadd.s32 112, %v2807_v54  ;;  %v855_v37 = vadd.s32 120, %v2807_v54 }
 0x1c4   : > { %v1829_v45 = vpop.f32.mrb[15].mxu0 }
 0x1c5   : > { %v785_v46 = vadd.f32 %v1827_v41, %v2817_v58  ;;  %v1830_v47 = vadd.f32 %v1829_v45, %v1828_v42  ;;  %1740 = vmatmul.mubr.msk.bf16.gmra.mrb[8].mxu1 %vm1738_vm9, %v1739_v40  ;;  %1869 = vmatpush3.bf16.msk.msra.mxu0 %vm1738_vm9, %v1739_v40  ;;  %v871_v45 = vadd.s32 %v2812_v56, %v854_v36  ;;  %v2907_v36 = vld [vmem:[%s3145_s25] ss:$0 sm:$0xff] }
 0x1c6   : > { %1115 = vmatprep.mubr.bf16.mxu1 %v2422_v51  ;;  %1870 = vmatprep.subr.bf16.mxu0 %v2423_v52 }
 0x1c7   : > { %v788_v49 = vadd.f32 %v1830_v47, %v2817_v58  ;;  %v829_v55 = vmax.f32 %v785_v46, 0.0  ;;  %v872_v46 = vadd.s32 %v2812_v56, %v855_v37  ;;  %vm887_vm6 = vcmp.lt.s32.totalorder %v871_v45, 300 }
 0x1c9   : > { %v830_v57 = vmax.f32 %v788_v49, 0.0  ;;  %v1831_v59 = vpop.f32.mrb[16].mxu0  ;;  %vm888_vm7 = vcmp.lt.s32.totalorder %v872_v46, 300 }
 0x1ca   : > { %v1832_v60 = vpop.f32.mrb[17].mxu0  ;;  %vm1753_vm8 = vmpackc.low %vm888_vm7, %vm887_vm6 }
 0x1cb   : > { %v1742_v62 = vpack.c.bf16 %v830_v57, %v829_v55  ;;  %v1833_v63 = vadd.f32 %v1832_v60, %v1831_v59  ;;  %v1834_v0 = vpop.f32.mrb[18].mxu0  ;;  %v2881_v60 = vsub.s32 0, %v2807_v54 }
 0x1cc   : > { %v1835_v2 = vpop.f32.mrb[19].mxu0 }
 0x1cd   : > { %v793_v3 = vadd.f32 %v1833_v63, %v2817_v58  ;;  %v1836_v4 = vadd.f32 %v1835_v2, %v1834_v0  ;;  %1743 = vmatmul.mubr.msk.bf16.gmra.mrb[12].mxu1 %vm1741_vm12, %v1742_v62  ;;  %1871 = vmatpush3.bf16.msk.msra.mxu0 %vm1741_vm12, %v1742_v62  ;;  %v969_v62 = vsub.s32 1, %v2807_v54  ;;  %v2888_v63 = vrot.slane %v961_v61, %v2881_v60 }
 0x1ce   : > { %1125 = vmatprep.mubr.bf16.mxu1 %v2422_v51  ;;  %1872 = vmatprep.subr.bf16.mxu0 %v2423_v52  ;;  %vm2424_vm12 = vmmov 0  }
 0x1cf   : > { %v796_v5 = vadd.f32 %v1836_v4, %v2817_v58  ;;  %v831_v8 = vmax.f32 %v793_v3, 0.0  ;;  %v2890_v0 = vrot.slane %v961_v61, %v969_v62  ;;  %1880 = vmatprep.mubr.msk.bf16.mxu0 %vm2424_vm12, %v2423_v52 }
 0x1d1   : > { %v832_v9 = vmax.f32 %v796_v5, 0.0  ;;  %v1837_v10 = vpop.f32.mrb[20].mxu0 }
 0x1d2   : > { %v1838_v11 = vpop.f32.mrb[21].mxu0 }
 0x1d3   : > { %v1745_v12 = vpack.c.bf16 %v832_v9, %v831_v8  ;;  %v1839_v13 = vadd.f32 %v1838_v11, %v1837_v10  ;;  %v1840_v14 = vpop.f32.mrb[22].mxu0 }
 0x1d4   : > { %v1841_v17 = vpop.f32.mrb[23].mxu0 }
 0x1d5   : > { %v801_v18 = vadd.f32 %v1839_v13, %v2817_v58  ;;  %v1842_v19 = vadd.f32 %v1841_v17, %v1840_v14  ;;  %1746 = vmatmul.mubr.msk.bf16.gmra.mrb[16].mxu1 %vm1744_vm15, %v1745_v12  ;;  %1873 = vmatpush3.bf16.msk.msra.mxu0 %vm1744_vm15, %v1745_v12 }
 0x1d6   : > { %1135 = vmatprep.mubr.bf16.mxu1 %v2422_v51  ;;  %1874 = vmatprep.subr.bf16.mxu0 %v2423_v52 }
 0x1d7   : > { %v804_v21 = vadd.f32 %v1842_v19, %v2817_v58  ;;  %v833_v23 = vmax.f32 %v801_v18, 0.0 }
 0x1d9   : > { %v834_v24 = vmax.f32 %v804_v21, 0.0  ;;  %v1843_v25 = vpop.f32.mrb[24].mxu0 }
 0x1da   : > { %v1844_v26 = vpop.f32.mrb[25].mxu0 }
 0x1db   : > { %v1748_v28 = vpack.c.bf16 %v834_v24, %v833_v23  ;;  %v1845_v29 = vadd.f32 %v1844_v26, %v1843_v25  ;;  %v1846_v30 = vpop.f32.mrb[26].mxu0 }
 0x1dc   : > { %v1847_v32 = vpop.f32.mrb[27].mxu0 }
 0x1dd   : > { %v809_v33 = vadd.f32 %v1845_v29, %v2817_v58  ;;  %v1848_v34 = vadd.f32 %v1847_v32, %v1846_v30  ;;  %1749 = vmatmul.mubr.msk.bf16.gmra.mrb[20].mxu1 %vm1747_vm2, %v1748_v28  ;;  %1875 = vmatpush3.bf16.msk.msra.mxu0 %vm1747_vm2, %v1748_v28 }
 0x1de   : > { %1145 = vmatprep.mubr.bf16.mxu1 %v2422_v51  ;;  %1876 = vmatprep.subr.bf16.mxu0 %v2423_v52 }
 0x1df   : > { %v812_v35 = vadd.f32 %v1848_v34, %v2817_v58  ;;  %v835_v38 = vmax.f32 %v809_v33, 0.0 }
 0x1e1   : > { %v836_v39 = vmax.f32 %v812_v35, 0.0  ;;  %v1849_v40 = vpop.f32.mrb[28].mxu0 }
 0x1e2   : > { %v1850_v41 = vpop.f32.mrb[29].mxu0 }
 0x1e3   : > { %v1751_v42 = vpack.c.bf16 %v836_v39, %v835_v38  ;;  %v1851_v43 = vadd.f32 %v1850_v41, %v1849_v40  ;;  %v1852_v44 = vpop.f32.mrb[30].mxu0 }
 0x1e4   : > { %v1853_v47 = vpop.f32.mrb[31].mxu0 }
 0x1e5   : > { %v817_v48 = vadd.f32 %v1851_v43, %v2817_v58  ;;  %v1854_v49 = vadd.f32 %v1853_v47, %v1852_v44  ;;  %1752 = vmatmul.mubr.msk.bf16.gmra.mrb[24].mxu1 %vm1750_vm5, %v1751_v42  ;;  %1877 = vmatpush3.bf16.msk.msra.mxu0 %vm1750_vm5, %v1751_v42 }
 0x1e6   : > { %1155 = vmatprep.mubr.bf16.mxu1 %v2422_v51  ;;  %1878 = vmatprep.subr.bf16.mxu0 %v2423_v52 }
 0x1e7   : > { %v820_v50 = vadd.f32 %v1854_v49, %v2817_v58  ;;  %v837_v55 = vmax.f32 %v817_v48, 0.0 }
 0x1e9   : > { %v838_v57 = vmax.f32 %v820_v50, 0.0 }
 0x1eb   : > { %v1754_v59 = vpack.c.bf16 %v838_v57, %v837_v55 }
 0x1ed   : > { %1755 = vmatmul.mubr.msk.bf16.gmra.mrb[28].mxu1 %vm1753_vm8, %v1754_v59  ;;  %1879 = vmatpush3.bf16.msk.msra.mxu0 %vm1753_vm8, %v1754_v59 }
 0x288   : > { %v1087_v58 = vpop.f32.mrb[0].mxu1 }
 0x289   : > { %v1089_v1 = vpop.f32.mrb[1].mxu1  ;;  %v1088_v3 = vadd.f32 %v1087_v58, %v2888_v63 }
 0x28a   : > { %v1091_v2 = vpop.f32.mrb[2].mxu1  ;;  %v1090_v6 = vadd.f32 %v1089_v1, %v2890_v0 }
 0x28b   : > { %v1092_v4 = vadd.f32 %v1091_v2, %v2888_v63  ;;  %v1093_v5 = vpop.f32.mrb[3].mxu1 }
 0x28c   : > { %v1094_v7 = vadd.f32 %v1093_v5, %v2890_v0 }
 0x28d   : > { %v1166_v8 = vpack.c.bf16 %v1092_v4, %v1088_v3 }
 0x28e   : > { %v1167_v9 = vpack.c.bf16 %v1094_v7, %v1090_v6 }
 0x290   : > { %2107 = vtanh.bf16 %v1167_v9  ;;  %v1097_v54 = vpop.f32.mrb[4].mxu1 }
 0x291   : > { %v1099_v10 = vpop.f32.mrb[5].mxu1  ;;  %v1098_v12 = vadd.f32 %v1097_v54, %v2888_v63  ;;  %2109 = vtanh.bf16 %v1166_v8 }
 0x292   : > { %v1101_v11 = vpop.f32.mrb[6].mxu1  ;;  %v1100_v15 = vadd.f32 %v1099_v10, %v2890_v0 }
 0x293   : > { %v1102_v13 = vadd.f32 %v1101_v11, %v2888_v63  ;;  %v1103_v14 = vpop.f32.mrb[7].mxu1 }
 0x294   : > { %v1104_v16 = vadd.f32 %v1103_v14, %v2890_v0 }
 0x295   : > { %v1168_v17 = vpack.c.bf16 %v1102_v13, %v1098_v12 }
 0x296   : > { %v1169_v18 = vpack.c.bf16 %v1104_v16, %v1100_v15 }
 0x298   : > { %2111 = vtanh.bf16 %v1169_v18  ;;  %v1107_v19 = vpop.f32.mrb[8].mxu1 }
 0x299   : > { %v1109_v20 = vpop.f32.mrb[9].mxu1  ;;  %v1108_v23 = vadd.f32 %v1107_v19, %v2888_v63  ;;  %2113 = vtanh.bf16 %v1168_v17 }
 0x29a   : > { %v1111_v21 = vpop.f32.mrb[10].mxu1  ;;  %v1110_v27 = vadd.f32 %v1109_v20, %v2890_v0 }
 0x29b   : > { %v2108_v22 = vpop.eup %2107  ;;  %v1112_v24 = vadd.f32 %v1111_v21, %v2888_v63  ;;  %v1113_v25 = vpop.f32.mrb[11].mxu1 }
 0x29c   : > { %v1198_v26 = vmul.bf16 1056980736, %v2108_v22  ;;  %v1114_v28 = vadd.f32 %v1113_v25, %v2890_v0  ;;  %v2110_v32 = vpop.eup %2109 }
 0x29d   : > { %v1170_v29 = vpack.c.bf16 %v1112_v24, %v1108_v23 }
 0x29e   : > { %v1171_v30 = vpack.c.bf16 %v1114_v28, %v1110_v27  ;;  %v1206_v31 = vadd.bf16 1056980736, %v1198_v26 }
 0x2a0   : > { %2115 = vtanh.bf16 %v1171_v30  ;;  %v1117_v33 = vpop.f32.mrb[12].mxu1  ;;  %v1214_v34 = vmul.bf16 %v2110_v32, %v1206_v31 }
 0x2a1   : > { %v1119_v35 = vpop.f32.mrb[13].mxu1  ;;  %2117 = vtanh.bf16 %v1170_v29  ;;  %v1118_v40 = vadd.f32 %v1117_v33, %v2888_v63 }
 0x2a2   : > { %v1121_v37 = vpop.f32.mrb[14].mxu1  ;;  %v1223_v38 = vunpack.c.l.bf16 %v1214_v34  ;;  %v1120_v41 = vadd.f32 %v1119_v35, %v2890_v0  ;;  %v1224_v47 = vunpack.c.h.bf16 %v1214_v34 }
 0x2a3   : > { %v2112_v39 = vpop.eup %2111  ;;  %v1122_v42 = vadd.f32 %v1121_v37, %v2888_v63  ;;  %v1123_v43 = vpop.f32.mrb[15].mxu1 }
 0x2a4   : > { %v1199_v44 = vmul.bf16 1056980736, %v2112_v39  ;;  %v1124_v45 = vadd.f32 %v1123_v43, %v2890_v0  ;;  %v1245_v46 = vmul.f32 %v2907_v36, %v1223_v38  ;;  %v2114_v55 = vpop.eup %2113  ;;  %v1246_v59 = vmul.f32 %v2907_v36, %v1224_v47 }
 0x2a5   : > { %v1172_v48 = vpack.c.bf16 %v1122_v42, %v1118_v40 }
 0x2a6   : > { %v1173_v49 = vpack.c.bf16 %v1124_v45, %v1120_v41  ;;  %1261 = vadd.xlane.f32.xlu0 %v1245_v46  ;;  %v1207_v50 = vadd.bf16 1056980736, %v1199_v44 }
 0x2a8   : > { %2119 = vtanh.bf16 %v1173_v49  ;;  %v1127_v57 = vpop.f32.mrb[16].mxu1  ;;  %v1215_v61 = vmul.bf16 %v2114_v55, %v1207_v50 }
 0x2a9   : > { %v1129_v62 = vpop.f32.mrb[17].mxu1  ;;  %2121 = vtanh.bf16 %v1172_v48  ;;  %v1128_v3 = vadd.f32 %v1127_v57, %v2888_v63 }
 0x2aa   : > { %v1131_v58 = vpop.f32.mrb[18].mxu1  ;;  %1263 = vadd.xlane.f32.xlu0 %v1246_v59  ;;  %v1225_v1 = vunpack.c.l.bf16 %v1215_v61  ;;  %v1130_v4 = vadd.f32 %v1129_v62, %v2890_v0  ;;  %v1226_v54 = vunpack.c.h.bf16 %v1215_v61 }
 0x2ab   : > { %v2116_v2 = vpop.eup %2115  ;;  %v1132_v5 = vadd.f32 %v1131_v58, %v2888_v63  ;;  %v1133_v6 = vpop.f32.mrb[19].mxu1 }
 0x2ac   : > { %v1200_v7 = vmul.bf16 1056980736, %v2116_v2  ;;  %v1134_v8 = vadd.f32 %v1133_v6, %v2890_v0  ;;  %v1247_v9 = vmul.f32 %v2907_v36, %v1225_v1  ;;  %v2118_v11 = vpop.eup %2117  ;;  %v1248_v15 = vmul.f32 %v2907_v36, %v1226_v54 }
 0x2ad   : > { %v1174_v10 = vpack.c.bf16 %v1132_v5, %v1128_v3 }
 0x2ae   : > { %v1208_v12 = vadd.bf16 1056980736, %v1200_v7  ;;  %v1175_v13 = vpack.c.bf16 %v1134_v8, %v1130_v4  ;;  %1265 = vadd.xlane.f32.xlu1 %v1247_v9 }
 0x2b0   : > { %2123 = vtanh.bf16 %v1175_v13  ;;  %v1137_v14 = vpop.f32.mrb[20].mxu1  ;;  %v1216_v16 = vmul.bf16 %v2118_v11, %v1208_v12 }
 0x2b1   : > { %v1139_v17 = vpop.f32.mrb[21].mxu1  ;;  %2125 = vtanh.bf16 %v1174_v10  ;;  %v1138_v22 = vadd.f32 %v1137_v14, %v2888_v63 }
 0x2b2   : > { %v1141_v18 = vpop.f32.mrb[22].mxu1  ;;  %1267 = vadd.xlane.f32.xlu1 %v1248_v15  ;;  %v1228_v19 = vunpack.c.h.bf16 %v1216_v16  ;;  %v1227_v20 = vunpack.c.l.bf16 %v1216_v16  ;;  %v1140_v23 = vadd.f32 %v1139_v17, %v2890_v0 }
 0x2b3   : > { %v2120_v21 = vpop.eup %2119  ;;  %v1142_v24 = vadd.f32 %v1141_v18, %v2888_v63  ;;  %v1143_v25 = vpop.f32.mrb[23].mxu1 }
 0x2b4   : > { %v1201_v26 = vmul.bf16 1056980736, %v2120_v21  ;;  %v1144_v27 = vadd.f32 %v1143_v25, %v2890_v0  ;;  %v1250_v28 = vmul.f32 %v2907_v36, %v1228_v19  ;;  %v1249_v29 = vmul.f32 %v2907_v36, %v1227_v20  ;;  %v2122_v31 = vpop.eup %2121 }
 0x2b5   : > { %v1176_v30 = vpack.c.bf16 %v1142_v24, %v1138_v22 }
 0x2b6   : > { %v1209_v32 = vadd.bf16 1056980736, %v1201_v26  ;;  %v1177_v33 = vpack.c.bf16 %v1144_v27, %v1140_v23  ;;  %1271 = vadd.xlane.f32.xlu1 %v1250_v28  ;;  %1269 = vadd.xlane.f32.xlu0 %v1249_v29 }
 0x2b8   : > { %2127 = vtanh.bf16 %v1177_v33  ;;  %v1147_v34 = vpop.f32.mrb[24].mxu1  ;;  %v1217_v35 = vmul.bf16 %v2122_v31, %v1209_v32 }
 0x2b9   : > { %v1149_v37 = vpop.f32.mrb[25].mxu1  ;;  %2129 = vtanh.bf16 %v1176_v30  ;;  %v1148_v42 = vadd.f32 %v1147_v34, %v2888_v63 }
 0x2ba   : > { %v1151_v38 = vpop.f32.mrb[26].mxu1  ;;  %v1230_v39 = vunpack.c.h.bf16 %v1217_v35  ;;  %v1229_v40 = vunpack.c.l.bf16 %v1217_v35  ;;  %v1150_v43 = vadd.f32 %v1149_v37, %v2890_v0 }
 0x2bb   : > { %v2124_v41 = vpop.eup %2123  ;;  %v1152_v44 = vadd.f32 %v1151_v38, %v2888_v63  ;;  %v1153_v45 = vpop.f32.mrb[27].mxu1  ;;  %v1757_v38 = vld [vmem:[#allocation5] ss:$0 sm:$0xff] }
 0x2bc   : > { %v1202_v46 = vmul.bf16 1056980736, %v2124_v41  ;;  %v1154_v47 = vadd.f32 %v1153_v45, %v2890_v0  ;;  %v1252_v48 = vmul.f32 %v2907_v36, %v1230_v39  ;;  %v1251_v49 = vmul.f32 %v2907_v36, %v1229_v40  ;;  %v2126_v55 = vpop.eup %2125 }
 0x2bd   : > { %v1178_v50 = vpack.c.bf16 %v1152_v44, %v1148_v42 }
 0x2be   : > { %v1210_v57 = vadd.bf16 1056980736, %v1202_v46  ;;  %v1179_v59 = vpack.c.bf16 %v1154_v47, %v1150_v43  ;;  %1275 = vadd.xlane.f32.xlu1 %v1252_v48  ;;  %1273 = vadd.xlane.f32.xlu0 %v1251_v49 }
 0x2c0   : > { %2131 = vtanh.bf16 %v1179_v59  ;;  %v1157_v61 = vpop.f32.mrb[28].mxu1  ;;  %v1218_v62 = vmul.bf16 %v2126_v55, %v1210_v57 }
 0x2c1   : > { %v1159_v58 = vpop.f32.mrb[29].mxu1  ;;  %2133 = vtanh.bf16 %v1178_v50  ;;  %v1158_v5 = vadd.f32 %v1157_v61, %v2888_v63 }
 0x2c2   : > { %v1161_v1 = vpop.f32.mrb[30].mxu1  ;;  %v1232_v2 = vunpack.c.h.bf16 %v1218_v62  ;;  %v1231_v3 = vunpack.c.l.bf16 %v1218_v62  ;;  %v1160_v6 = vadd.f32 %v1159_v58, %v2890_v0 }
 0x2c3   : > { %v2128_v4 = vpop.eup %2127  ;;  %v1162_v7 = vadd.f32 %v1161_v1, %v2888_v63  ;;  %v1163_v8 = vpop.f32.mrb[31].mxu1 }
 0x2c4   : > { %v1203_v9 = vmul.bf16 1056980736, %v2128_v4  ;;  %v1164_v54 = vadd.f32 %v1163_v8, %v2890_v0  ;;  %v1254_v10 = vmul.f32 %v2907_v36, %v1232_v2  ;;  %v1253_v11 = vmul.f32 %v2907_v36, %v1231_v3  ;;  %v2130_v13 = vpop.eup %2129 }
 0x2c5   : > { %v1180_v12 = vpack.c.bf16 %v1162_v7, %v1158_v5 }
 0x2c6   : > { %v1211_v14 = vadd.bf16 1056980736, %v1203_v9  ;;  %v1181_v15 = vpack.c.bf16 %v1164_v54, %v1160_v6  ;;  %1279 = vadd.xlane.f32.xlu1 %v1254_v10  ;;  %1277 = vadd.xlane.f32.xlu0 %v1253_v11 }
 0x2c8   : > { %2135 = vtanh.bf16 %v1181_v15  ;;  %v1219_v16 = vmul.bf16 %v2130_v13, %v1211_v14  ;;  %v1350_v13 = vand.u32 127, %v839_v53 }
 0x2c9   : > { %2137 = vtanh.bf16 %v1180_v12 }
 0x2ca   : > { %v1234_v17 = vunpack.c.h.bf16 %v1219_v16  ;;  %v1233_v18 = vunpack.c.l.bf16 %v1219_v16  ;;  %v1351_v14 = vadd.s32 %v1350_v13, %v2812_v56 }
 0x2cb   : > { %v2132_v19 = vpop.eup %2131 }
 0x2cc   : > { %v1204_v63 = vmul.bf16 1056980736, %v2132_v19  ;;  %v1256_v20 = vmul.f32 %v2907_v36, %v1234_v17  ;;  %v1255_v0 = vmul.f32 %v2907_v36, %v1233_v18  ;;  %v2134_v21 = vpop.eup %2133  ;;  %vm1352_vm9 = vcmp.lt.s32.totalorder %v1351_v14, 300  ;;  %v1354_v18 = vld [vmem:[#allocation2] sm:$0x1] }
 0x2ce   : > { %v1212_v22 = vadd.bf16 1056980736, %v1204_v63  ;;  %1283 = vadd.xlane.f32.xlu1 %v1256_v20  ;;  %1281 = vadd.xlane.f32.xlu0 %v1255_v0 }
 0x2d0   : > { %v1220_v23 = vmul.bf16 %v2134_v21, %v1212_v22 }
 0x2d2   : > { %v1236_v24 = vunpack.c.h.bf16 %v1220_v23  ;;  %v1235_v25 = vunpack.c.l.bf16 %v1220_v23 }
 0x2d3   : > { %v2136_v26 = vpop.eup %2135 }
 0x2d4   : > { %v1205_v27 = vmul.bf16 1056980736, %v2136_v26  ;;  %v1258_v28 = vmul.f32 %v2907_v36, %v1236_v24  ;;  %v1257_v29 = vmul.f32 %v2907_v36, %v1235_v25  ;;  %v2138_v31 = vpop.eup %2137  ;;  %v1375_v26 = vld [vmem:[#allocation3] sm:$0x1] }
 0x2d6   : > { %v1213_v30 = vadd.bf16 1056980736, %v1205_v27  ;;  %1287 = vadd.xlane.f32.xlu1 %v1258_v28  ;;  %1285 = vadd.xlane.f32.xlu0 %v1257_v29 }
 0x2d8   : > { %v1221_v32 = vmul.bf16 %v2138_v31, %v1213_v30  ;;  %v1383_v31 = vld [vmem:[#allocation4] sm:$0x1] }
 0x2da   : > { %v1238_v33 = vunpack.c.h.bf16 %v1221_v32  ;;  %v1237_v34 = vunpack.c.l.bf16 %v1221_v32 }
 0x2dc   : > { %v1260_v35 = vmul.f32 %v2907_v36, %v1238_v33  ;;  %v1259_v37 = vmul.f32 %v2907_v36, %v1237_v34 }
 0x2de   : > { %1291 = vadd.xlane.f32.xlu1 %v1260_v35  ;;  %1289 = vadd.xlane.f32.xlu0 %v1259_v37 }
 0x333   : > { %v1262_v39 = vpop.xlane.xlu0 %1261 }
 0x334   : > { %v1300_v40 = vadd.f32 %v1757_v38, %v1262_v39 }
 0x336   : > { %1316 = vxpose.xlu0.b32.start [1/16] (narrow) %v1300_v40, 8 }
 0x337   : > { %v1264_v41 = vpop.xlane.xlu0 %1263 }
 0x338   : > { %v1301_v42 = vadd.f32 %v1757_v38, %v1264_v41 }
 0x33a   : > { %1317 = vxpose.xlu0.b32.cont [2/16] (narrow) %v1301_v42, 8 }
 0x33b   : > { %v1266_v43 = vpop.xlane.xlu1 %1265 }
 0x33c   : > { %v1302_v44 = vadd.f32 %v1757_v38, %v1266_v43 }
 0x33e   : > { %1318 = vxpose.xlu0.b32.cont [3/16] (narrow) %v1302_v44, 8 }
 0x33f   : > { %v1268_v45 = vpop.xlane.xlu1 %1267 }
 0x340   : > { %v1303_v46 = vadd.f32 %v1757_v38, %v1268_v45 }
 0x342   : > { %1319 = vxpose.xlu0.b32.cont [4/16] (narrow) %v1303_v46, 8 }
 0x343   : > { %v1270_v47 = vpop.xlane.xlu0 %1269  ;;  %v1272_v49 = vpop.xlane.xlu1 %1271 }
 0x344   : > { %v1304_v48 = vadd.f32 %v1757_v38, %v1270_v47  ;;  %v1305_v36 = vadd.f32 %v1757_v38, %v1272_v49 }
 0x346   : > { %1320 = vxpose.xlu0.b32.cont [5/16] (narrow) %v1304_v48, 8 }
 0x34a   : > { %1321 = vxpose.xlu0.b32.cont [6/16] (narrow) %v1305_v36, 8 }
 0x34b   : > { %v1274_v50 = vpop.xlane.xlu0 %1273  ;;  %v1276_v57 = vpop.xlane.xlu1 %1275 }
 0x34c   : > { %v1306_v55 = vadd.f32 %v1757_v38, %v1274_v50  ;;  %v1307_v59 = vadd.f32 %v1757_v38, %v1276_v57 }
 0x34e   : > { %1322 = vxpose.xlu0.b32.cont [7/16] (narrow) %v1306_v55, 8 }
 0x352   : > { %1323 = vxpose.xlu0.b32.cont [8/16] (narrow) %v1307_v59, 8 }
 0x353   : > { %v1278_v61 = vpop.xlane.xlu0 %1277  ;;  %v1280_v58 = vpop.xlane.xlu1 %1279 }
 0x354   : > { %v1308_v62 = vadd.f32 %v1757_v38, %v1278_v61  ;;  %v1309_v1 = vadd.f32 %v1757_v38, %v1280_v58 }
 0x356   : > { %1324 = vxpose.xlu0.b32.cont [9/16] (narrow) %v1308_v62, 8 }
 0x35a   : > { %1325 = vxpose.xlu0.b32.cont [10/16] (narrow) %v1309_v1, 8 }
 0x35b   : > { %v1282_v2 = vpop.xlane.xlu0 %1281  ;;  %v1284_v4 = vpop.xlane.xlu1 %1283 }
 0x35c   : > { %v1310_v3 = vadd.f32 %v1757_v38, %v1282_v2  ;;  %v1311_v5 = vadd.f32 %v1757_v38, %v1284_v4 }
 0x35e   : > { %1326 = vxpose.xlu0.b32.cont [11/16] (narrow) %v1310_v3, 8 }
 0x362   : > { %1327 = vxpose.xlu0.b32.cont [12/16] (narrow) %v1311_v5, 8 }
 0x363   : > { %v1286_v6 = vpop.xlane.xlu0 %1285  ;;  %v1288_v8 = vpop.xlane.xlu1 %1287 }
 0x364   : > { %v1312_v7 = vadd.f32 %v1757_v38, %v1286_v6  ;;  %v1313_v9 = vadd.f32 %v1757_v38, %v1288_v8 }
 0x366   : > { %1328 = vxpose.xlu0.b32.cont [13/16] (narrow) %v1312_v7, 8 }
 0x36a   : > { %1329 = vxpose.xlu0.b32.cont [14/16] (narrow) %v1313_v9, 8 }
 0x36b   : > { %v1290_v54 = vpop.xlane.xlu0 %1289  ;;  %v1292_v11 = vpop.xlane.xlu1 %1291 }
 0x36c   : > { %v1314_v10 = vadd.f32 %v1757_v38, %v1290_v54  ;;  %v1315_v12 = vadd.f32 %v1757_v38, %v1292_v11 }
 0x36e   : > { %1330 = vxpose.xlu0.b32.cont [15/16] (narrow) %v1314_v10, 8 }
 0x372   : > { %1331 = vxpose.xlu0.b32.end [16/16] (narrow) %v1315_v12, 8 }
 0x39b   : > { %2042 = vset.pattern.permute.xlu0 %v2422_v51 }
 0x3b6   : > { %v1332_v15 = vpop.trf.xlu0 }
 0x3b7   : > { %1348 = vst [vmem:[%s2780_s8] sm:$0x1] %v1332_v15  ;;  %v1353_v16 = vsel %vm1352_vm9, %v1332_v15, -1e+30 }
 0x3b8   : > { %v1356_v17 = vsel %vm1355_vm10, %v1353_v16, -inf }
 0x3b9   : > { %1357 = vmax.xlane.f32.xlu1 %v1356_v17 }
 0x446   : > { %v1358_v19 = vpop.xlane.xlu1 %1357 }
 0x447   : > { %v1359_v63 = vmax.f32 %v1354_v18, %v1358_v19 }
 0x449   : > { %v1360_v20 = vsub.f32 %v1354_v18, %v1359_v63  ;;  %1437 = vst.msk [vmem:[#allocation2] sm:$0x1] %vm1381_vm11, %v1359_v63  ;;  %1365 = vperm.xlu1 %2041, %v1359_v63  }
 0x44b   : > { %v1361_v24 = vmul.f32 1.442695, %v1360_v20 }
 0x450   : > { %v1442_v39 = vld [vmem:[#allocation2] sm:$0x1] (!%p1782_p11) }
 0x451   : > { %1443 = vst.msk [vmem:[%s478_s6] sm:$0x1] (!%p1782_p11), %vm1381_vm11, %v1442_v39 }
 0x4c8   : > { %v1366_v51 = vpop.permute.xlu1 %1365 }
 0x4c9   : > { %v1371_v53 = vrot.slane %v1366_v51, %v2881_v60 }
 0x4cb   : > { %v1372_v56 = vsub.f32 %v1353_v16, %v1371_v53 }
 0x4cd   : > { %v1373_v0 = vmul.f32 1.442695, %v1372_v56 }
 0x4cf   : > { %2139 = vpow2.f32 %v1373_v0 }
 0x4d0   : > { %2141 = vpow2.f32 %v1361_v24 }
 0x4d9   : > { %v2140_v21 = vpop.eup %2139 }
 0x4da   : > { %v1377_v22 = vsel %vm1355_vm10, %v2140_v21, 0.0  ;;  %v1394_v23 = vpack.c.bf16 %v2140_v21, %v2140_v21  ;;  %v2142_v25 = vpop.eup %2141 }
 0x4db   : > { %1378 = vadd.xlane.f32.xlu1 %v1377_v22  ;;  %v1376_v27 = vmul.f32 %v2142_v25, %v1375_v26 }
 0x4dc   : > { %1881 = vmatmul.mubr.bf16.vlgmr.msra.gmra.mrb[32].mxu0 %v1394_v23 }
 0x4ec   : > { %1386 = vperm.xlu1 %2041, %v2142_v25  }
 0x568   : > { %v1379_v28 = vpop.xlane.xlu1 %1378 }
 0x569   : > { %v1380_v52 = vadd.f32 %v1379_v28, %v1376_v27 }
 0x56b   : > { %1382 = vst.msk [vmem:[#allocation3] sm:$0x1] %vm1381_vm11, %v1380_v52 }
 0x56c   : > { %v1387_v29 = vpop.permute.xlu1 %1386 }
 0x56d   : > { %v1392_v30 = vrot.slane %v1387_v29, %v2881_v60 }
 0x56f   : > { %v1393_v32 = vmul.f32 %v1392_v30, %v1383_v31 }
 0x572   : > { %v1444_v40 = vld [vmem:[#allocation3] sm:$0x1] (!%p1782_p11) }
 0x573   : > { %1445 = vst.msk [vmem:[%s481_s28] sm:$0x1] (!%p1782_p11), %vm1381_vm11, %v1444_v40 }
 0x5ac   : > { %1441 = sbr.rel (%p1782_p11) target bundleno = 1467 (0x5bb), region = 68 }
 0x5af   : > { %v1429_v33 = vpop.f32.mrb[32].mxu0 }
 0x5b0   : > { %v1435_v34 = vadd.f32 %v1429_v33, %v1393_v32  ;;  %v1882_v35 = vpop.f32.mrb[33].mxu0 }
 0x5b1   : > { %v1432_v37 = vpop.f32.mrb[34].mxu0 }
 0x5b2   : > { %1436 = vst [vmem:[#allocation4] sm:$0x1] %v1435_v34  ;;  %v1883_v38 = vpop.f32.mrb[35].mxu0 }
 0x5b9   : > { %v1446_v41 = vld [vmem:[#allocation4] sm:$0x1] }
 0x5ba   : > { %1447 = vst [vmem:[%s2784_s5] sm:$0x1] %v1446_v41 }
 0x5bb PF: > { %s1784_s23 = sshll.u32 %s2764_s4, 4  ;;  %s3148_s2 = sld [smem:[#allocation35_spill]] }
 0x5bc   : > { %s1473_s25 = sshll.u32 %s2780_s8, 4  ;;  %s1449_s6 = scalar_lea.sflag [#allocation8], %s446_s9  ;;  %s1474_s25 = int_to_ptr.vmem [resolvable:$true] %s1473_s25 }
 0x5bd   : > { %s2227_s11 = scalar_lea.vmem %s1474_s25, 16  ;;  %p3149_p13 = scmp.ne.s32.totalorder %s3125_s13, 0 }
 0x5be   : > { %p2228_p0 = scmp.ne.s32.totalorder %s1474_s25, %s2227_s11  ;;  %s2425_s15 = smov [#allocation12]  }
 0x5bf   : > { %s2231_s28 = sshll.u32 %s2425_s15, 4  ;;  %s2232_s28 = int_to_ptr.vmem [resolvable:$false] %s2231_s28 }
 0x5c0   : > { %p2229_p1 = pnand %p2228_p0, %p3149_p13  ;;  %s2233_s12 = scalar_lea.vmem %s2232_s28, 32 }
 0x5c1   : > { %s2974_s17 = scalar_lea.hbm %s3148_s2, %s1784_s23  ;;  %p2234_p5 = scmp.lt.s32.totalorder %s1474_s25, %s2232_s28 }
 0x5c2   : > { %p2230_p3 = pneg %p2229_p1  ;;  %p2235_p7 = scmp.lt.s32.totalorder %s2233_s12, %s2227_s11 }
 0x5c4   : > { %p2236_p9 = por %p2235_p7, %p2234_p5 }
 0x5c6   : > { %p2237_p8 = pnand %p2236_p9, %p2230_p3 }
 0x5c8   : > { %2240 = shalt.err (!%p2237_p8)
}
 0x5c9   : > { %s2241_s9 = scalar_lea.hbm %s2974_s17, 16  ;;  %s2245_s20 = scalar_lea.hbm %s3148_s2, 64 }
 0x5ca   : > { %p2242_p4 = scmp.ne.s32.totalorder %s2974_s17, %s2241_s9  ;;  %p2246_p12 = scmp.lt.u32.totalorder %s2974_s17, %s3148_s2 }
 0x5cb   : > { %p2247_p10 = scmp.lt.u32.totalorder %s2245_s20, %s2241_s9  ;;  %p2249_p0 = scmp.lt.u32.totalorder %s2241_s9, %s2974_s17 }
 0x5cc   : > { %p2243_p2 = pnand %p2242_p4, %p3149_p13 }
 0x5cd   : > { %p2248_p11 = por %p2247_p10, %p2246_p12 }
 0x5ce   : > { %p2244_p6 = pneg %p2243_p2 }
 0x5cf   : > { %p2250_p1 = por %p2249_p0, %p2248_p11 }
 0x5d1   : > { %p2251_p3 = pnand %p2250_p1, %p2244_p6 }
 0x5d3   : > { %2254 = shalt.err (!%p2251_p3)
}
 0x5d4   : > { %1893 = dma.vmem_to_hbm [thread:$0]  (%p3149_p13), %s1474_s25, 16, %s2974_s17, %s1449_s6  }
 0x5d5   : > { %s1785_s14 = sshll.u32 %s2397_s24, 4  ;;  %s1492_s23 = sshll.u32 %s2784_s5, 4  ;;  %s1493_s23 = int_to_ptr.vmem [resolvable:$true] %s1492_s23 }
 0x5d6   : > { %s3150_s11 = sld [smem:[#allocation38_spill]]  ;;  %s1459_s28 = scalar_lea.sflag [#allocation14], %s462_s30 }
 0x5d7   : > { %s2255_s12 = scalar_lea.vmem %s1493_s23, 16  ;;  %p3151_p7 = scmp.ne.s32.totalorder %s3132_s18, 0 }
 0x5d8   : > { %p2256_p5 = scmp.ne.s32.totalorder %s1493_s23, %s2255_s12  ;;  %s2426_s13 = smov [#allocation13]  }
 0x5d9   : > { %s2259_s9 = sshll.u32 %s2426_s13, 4  ;;  %s2260_s9 = int_to_ptr.vmem [resolvable:$false] %s2259_s9 }
 0x5da   : > { %p2257_p9 = pnand %p2256_p5, %p3151_p7  ;;  %s2261_s4 = scalar_lea.vmem %s2260_s9, 32 }
 0x5db   : > { %p2262_p13 = scmp.lt.s32.totalorder %s1493_s23, %s2260_s9  ;;  %p2263_p4 = scmp.lt.s32.totalorder %s2261_s4, %s2255_s12 }
 0x5dc   : > { %s3001_s15 = scalar_lea.hbm %s3150_s11, %s1785_s14  ;;  %p2258_p8 = pneg %p2257_p9 }
 0x5dd   : > { %p2264_p2 = por %p2263_p4, %p2262_p13 }
 0x5df   : > { %p2265_p6 = pnand %p2264_p2, %p2258_p8 }
 0x5e1   : > { %2268 = shalt.err (!%p2265_p6)
}
 0x5e2   : > { %s2269_s24 = scalar_lea.hbm %s3001_s15, 16  ;;  %s2273_s17 = scalar_lea.hbm %s3150_s11, 32 }
 0x5e3   : > { %p2270_p12 = scmp.ne.s32.totalorder %s3001_s15, %s2269_s24  ;;  %p2274_p0 = scmp.lt.u32.totalorder %s3001_s15, %s3150_s11 }
 0x5e4   : > { %p2275_p1 = scmp.lt.u32.totalorder %s2273_s17, %s2269_s24  ;;  %p2277_p5 = scmp.lt.u32.totalorder %s2269_s24, %s3001_s15 }
 0x5e5   : > { %p2271_p10 = pnand %p2270_p12, %p3151_p7 }
 0x5e6   : > { %p2276_p3 = por %p2275_p1, %p2274_p0 }
 0x5e7   : > { %p2272_p11 = pneg %p2271_p10 }
 0x5e8   : > { %p2278_p9 = por %p2277_p5, %p2276_p3 }
 0x5ea   : > { %p2279_p8 = pnand %p2278_p9, %p2272_p11 }
 0x5ec   : > { %2282 = shalt.err (!%p2279_p8)
}
 0x5ed   : > { %1894 = dma.vmem_to_hbm [thread:$0]  (%p3151_p7), %s1493_s23, 16, %s3001_s15, %s1459_s28  }
 0x5ee PF: > { %s3152_s8 = sld [smem:[#allocation21_spill]]  ;;  %s3153_s20 = sld [smem:[#allocation29_spill]] }
 0x5ef   : > { %p1915_p13 = scmp.ge.s32.totalorder %s2409_s27, 2 }
 0x5f4   : > { %s1504_s26 = sand.u32 1, %s3152_s8   ;;  %p3154_p4 = scmp.ne.s32.totalorder %s3153_s20, 0 }
 0x5f5   : > { %s1505_s29 = scalar_lea.sflag [#allocation8], %s1504_s26 }
 0x5f6   : > { %p1905_p2 = pnand %p1915_p13, %p3154_p4 }
 0x5f8   : > { %2348 = dma.done.wait (!%p1905_p2), %s1505_s29, 16  }
 0x5f9   : > { %2350 = vsyncadd (!%p1905_p2), %s1505_s29, 4294967280  ;;  %s3155_s14 = sld [smem:[#allocation19_spill]]  ;;  %s3156_s10 = sld [smem:[#allocation31_spill]] }
 0x5ff   : > { %s1524_s7 = sand.u32 1, %s3155_s14   ;;  %p3157_p6 = scmp.ne.s32.totalorder %s3156_s10, 0 }
 0x600   : > { %s1525_s12 = scalar_lea.sflag [#allocation14], %s1524_s7 }
 0x601   : > { %p1908_p12 = pnand %p1915_p13, %p3157_p6 }
 0x603   : > { %2352 = dma.done.wait (!%p1908_p12), %s1525_s12, 16  }
 0x604   : > { %2354 = vsyncadd (!%p1908_p12), %s1525_s12, 4294967280  ;;  %s33_s27 = sadd.s32 1, %s2409_s27   ;;  %s3159_s23 = sld [smem:[#allocation20_spill]] }
 0x605   : > { %p3030_p7 = scmp.ge.s32.totalorder %s33_s27, 6   ;;  %s3160_s17 = sld [smem:[#allocation30_spill]] }
 0x606   : > { %s3161_s28 = sld [smem:[#allocation22_spill]]  ;;  %s3162_s20 = sld [smem:[#allocation27_spill]] }
 0x607   : > { %s3163_s13 = sld [smem:[#allocation28_spill]]  ;;  %s3164_s9 = sld [smem:[#allocation23_spill]] }
 0x608   : > { %s3165_s24 = sld [smem:[#allocation24_spill]]  ;;  %s3166_s25 = sld [smem:[#allocation25_spill]] }
 0x609   : > { %s3167_s26 = sld [smem:[#allocation26_spill]]  ;;  %s3169_s15 = smov %s2361_s16 }
 0x60a   : > { %s3170_s16 = smov %s3159_s23  ;;  %s3171_s18 = smov %s2373_s19 }
 0x60b   : > { %s3173_s6 = smov %s2385_s21  ;;  %s3174_s21 = smov %s2389_s22 }
 0x60c   : > { %s3172_s19 = smov %s3161_s28  ;;  %32 = sbr.rel (!%p3030_p7) target bundleno = 21 (0x15), region = 150 }
 0x60d   : > { %s3175_s22 = smov %s3163_s13  ;;  %s3176_s23 = smov %s3164_s9 }
 0x613   :  { %1529 = vsyncpa [#allocation7], 1 }
 0x614   :  { %1531 = vsyncpa [#allocation7 + $0x1], 1 }
 0x615   :  { %1532 = vsyncpa [#allocation10], 1 }
 0x616   :  { %1533 = vsyncpa [#allocation8], 1 }
 0x617   :  { %1535 = vsyncpa [#allocation8 + $0x1], 1 }
 0x618   :  { %1536 = vsyncpa [#allocation14], 1 }
 0x619   :  { %1538 = vsyncpa [#allocation14 + $0x1], 1 }

</bundles_post_ra>
